<compile_context>
chip_gen: v7x
topology: tpu7x:2x2x1
jax: 0.10.0
libtpu: 0.0.40
codegen_flags: <defaults>
</compile_context>

<pallas_src>
import functools

import jax
import jax.numpy as jnp
from jax import lax
from jax.experimental import pallas as pl
from jax.experimental.pallas import tpu as pltpu


# ----------------------------- Pallas kernel -----------------------------

def encoder_kernel(x2_ref, wih1_ref, whh1_ref, b1_ref,
                   wih2_ref, whh2_ref, b2_ref, out_ref,
                   *, seq_len, hidden1, hidden2):
    T = seq_len
    H1 = hidden1          # rnn1 hidden size per direction (= 2 * embedding_dim)
    H2 = hidden2          # rnn2 hidden size (= embedding_dim)
    G = 2 * H1            # combined (fwd|bwd) width of one gate block

    # Hoisted weight loads (stay in vregs across the unrolled loops).
    whh1 = whh1_ref[...]  # (2*H1, 8*H1) block-diagonal, gate-interleaved
    whh2 = whh2_ref[...]  # (H2, 4*H2)

    # ---- rnn1: fused fwd+bwd, input projection hoisted out of the loop ----
    # gates1_all[s] columns: [i_f,i_b, f_f,f_b, g_f,g_b, o_f,o_b] (each H1 lanes);
    # fwd gates are driven by x[s], bwd gates by x[T-1-s] (via the pre-built x2 input).
    gates1_all = (jnp.dot(x2_ref[...], wih1_ref[...],
                          preferred_element_type=jnp.float32)
                  + b1_ref[...])                                # (T, 8*H1)

    h_cat = jnp.zeros((1, 2 * H1), jnp.float32)                 # [h_fwd | h_bwd]
    c_cat = jnp.zeros((1, 2 * H1), jnp.float32)
    h_steps = []
    for s in range(T):                                          # fully unrolled
        pre = gates1_all[s:s + 1, :] + jnp.dot(
            h_cat, whh1, preferred_element_type=jnp.float32)    # (1, 8*H1)
        i = jax.nn.sigmoid(pre[:, 0 * G:1 * G])
        f = jax.nn.sigmoid(pre[:, 1 * G:2 * G])
        g = jnp.tanh(pre[:, 2 * G:3 * G])
        o = jax.nn.sigmoid(pre[:, 3 * G:4 * G])
        c_cat = f * c_cat + i * g
        h_cat = o * jnp.tanh(c_cat)
        h_steps.append(h_cat)

    # Lane-dense (T, 2*H1) rnn1 output slab: fwd output of time t is step t's h_fwd,
    # bwd output of time t is step (T-1-t)'s h_bwd.
    y_fwd = jnp.concatenate([h_steps[t][:, :H1] for t in range(T)], axis=0)
    y_bwd = jnp.concatenate([h_steps[T - 1 - t][:, H1:] for t in range(T)], axis=0)
    y1 = jnp.concatenate([y_fwd, y_bwd], axis=-1)               # (T, 2*H1)

    # ---- rnn2: fused gates, input projection hoisted out of the loop ----
    gates2_all = (jnp.dot(y1, wih2_ref[...],
                          preferred_element_type=jnp.float32)
                  + b2_ref[...])                                # (T, 4*H2)

    h2 = jnp.zeros((1, H2), jnp.float32)
    c2 = jnp.zeros((1, H2), jnp.float32)
    for t in range(T):                                          # fully unrolled
        pre = gates2_all[t:t + 1, :] + jnp.dot(
            h2, whh2, preferred_element_type=jnp.float32)       # (1, 4*H2)
        i = jax.nn.sigmoid(pre[:, 0 * H2:1 * H2])
        f = jax.nn.sigmoid(pre[:, 1 * H2:2 * H2])
        g = jnp.tanh(pre[:, 2 * H2:3 * H2])
        o = jax.nn.sigmoid(pre[:, 3 * H2:4 * H2])
        c2 = f * c2 + i * g
        h2 = o * jnp.tanh(c2)

    out_ref[...] = h2


# ----------------------------- Wrapper -----------------------------

def encoder_forward(x, kparams, embedding_dim):
    """x: (seq_len, n_features) float32; returns (n_features, embedding_dim)."""
    seq_len, n_features = x.shape
    H1 = 2 * embedding_dim
    H2 = embedding_dim

    # Layout plumbing (wrapper-side): X2[t] = [x[t], x[T-1-t]] feeds the fwd/bwd row
    # blocks of the block-diagonal fused rnn1 input-projection weight.
    x2 = jnp.concatenate([x, x[::-1]], axis=-1)                 # (T, 2*n_features)

    kernel = functools.partial(encoder_kernel, seq_len=seq_len,
                               hidden1=H1, hidden2=H2)
    vmem_spec = pl.BlockSpec(memory_space=pltpu.MemorySpace.VMEM)

    out = pl.pallas_call(
        kernel,
        out_shape=jax.ShapeDtypeStruct((1, H2), jnp.float32),
        in_specs=[vmem_spec] * (1 + len(kparams)),
        out_specs=vmem_spec,
    )(x2, *kparams)
    # hidden_n.reshape((n_features, embedding_dim)) — valid only for n_features == 1
    return out.reshape(n_features, embedding_dim)


# ----------------------------- Parameter setup -----------------------------

def _lstm_raw_weights(key, in_dim, hidden):
    """PyTorch-layout LSTM weights: w_ih (4H,in), w_hh (4H,H), b_ih (4H,), b_hh (4H,)."""
    k = 1.0 / jnp.sqrt(jnp.float32(hidden))
    ks = jax.random.split(key, 4)
    w_ih = jax.random.uniform(ks[0], (4 * hidden, in_dim), jnp.float32, -k, k)
    w_hh = jax.random.uniform(ks[1], (4 * hidden, hidden), jnp.float32, -k, k)
    b_ih = jax.random.uniform(ks[2], (4 * hidden,), jnp.float32, -k, k)
    b_hh = jax.random.uniform(ks[3], (4 * hidden,), jnp.float32, -k, k)
    return w_ih, w_hh, b_ih, b_hh


def _interleave_fwd_bwd(a_f, a_b, hidden):
    """(rows, 4H) fwd & bwd -> (2*rows, 8H) block-diag with per-gate [fwd|bwd] columns."""
    rows = a_f.shape[0]
    af = a_f.reshape(rows, 4, hidden)
    ab = a_b.reshape(rows, 4, hidden)
    z = jnp.zeros_like(af)
    top = jnp.stack([af, z], axis=2).reshape(rows, 8 * hidden)   # fwd rows
    bot = jnp.stack([z, ab], axis=2).reshape(rows, 8 * hidden)   # bwd rows
    return jnp.concatenate([top, bot], axis=0)


def make_params(key, n_features, embedding_dim):
    H1 = 2 * embedding_dim        # rnn1 hidden size (per direction)
    H2 = embedding_dim            # rnn2 hidden size
    k1f, k1b, k2 = jax.random.split(key, 3)
    raw1f = _lstm_raw_weights(k1f, n_features, H1)
    raw1b = _lstm_raw_weights(k1b, n_features, H1)
    raw2 = _lstm_raw_weights(k2, 2 * H1, H2)

    w_ih_f, w_hh_f, b_ih_f, b_hh_f = raw1f
    w_ih_b, w_hh_b, b_ih_b, b_hh_b = raw1b
    w_ih_2, w_hh_2, b_ih_2, b_hh_2 = raw2

    # rnn1: fused block-diagonal weights; gate columns interleaved as
    # [i_f,i_b, f_f,f_b, g_f,g_b, o_f,o_b] (each H1 lanes). Gate order matches PyTorch.
    wih1 = _interleave_fwd_bwd(w_ih_f.T, w_ih_b.T, H1)           # (2*n_features, 8*H1)
    whh1 = _interleave_fwd_bwd(w_hh_f.T, w_hh_b.T, H1)           # (2*H1, 8*H1)
    bf = (b_ih_f + b_hh_f).reshape(4, H1)
    bb = (b_ih_b + b_hh_b).reshape(4, H1)
    b1 = jnp.stack([bf, bb], axis=1).reshape(1, 8 * H1)          # (1, 8*H1)

    # rnn2: fused gate weights.
    wih2 = w_ih_2.T                                              # (2*H1, 4*H2)
    whh2 = w_hh_2.T                                              # (H2, 4*H2)
    b2 = (b_ih_2 + b_hh_2).reshape(1, 4 * H2)                    # (1, 4*H2)

    kparams = (wih1, whh1, b1, wih2, whh2, b2)
    return kparams, (raw1f, raw1b, raw2)


# ----------------------------- Pure-JAX reference -----------------------------

def _lstm_ref(x, w_ih, w_hh, b_ih, b_hh, hidden, reverse=False):
    def step(carry, x_t):
        h, c = carry
        gates = x_t @ w_ih.T + h @ w_hh.T + b_ih + b_hh
        i, f, g, o = jnp.split(gates, 4)
        i = jax.nn.sigmoid(i); f = jax.nn.sigmoid(f)
        g = jnp.tanh(g); o = jax.nn.sigmoid(o)
        c = f * c + i * g
        h = o * jnp.tanh(c)
        return (h, c), h
    xs = x[::-1] if reverse else x
    (h, _), ys = lax.scan(step, (jnp.zeros(hidden), jnp.zeros(hidden)), xs)
    ys = ys[::-1] if reverse else ys
    return ys, h


def encoder_ref(x, raw_params, n_features, embedding_dim):
    raw1f, raw1b, raw2 = raw_params
    H1, H2 = 2 * embedding_dim, embedding_dim
    yf, _ = _lstm_ref(x, *raw1f, hidden=H1, reverse=False)
    yb, _ = _lstm_ref(x, *raw1b, hidden=H1, reverse=True)
    y1 = jnp.concatenate([yf, yb], axis=-1)
    _, h2 = _lstm_ref(y1, *raw2, hidden=H2, reverse=False)
    return h2.reshape(n_features, embedding_dim)


# ----------------------------- Main -----------------------------

if __name__ == "__main__":
    seq_len, n_features, embedding_dim = 8, 1, 32   # n_features must be 1 (module reshape requires it)

    key = jax.random.PRNGKey(0)
    kx, kp = jax.random.split(key)
    x = jax.random.normal(kx, (seq_len, n_features), jnp.float32)

    kparams, raw_params = make_params(kp, n_features, embedding_dim)

    out = encoder_forward(x, kparams, embedding_dim)
    out = jax.block_until_ready(out)

    ref = encoder_ref(x, raw_params, n_features, embedding_dim)
    assert out.shape == (n_features, embedding_dim)
    assert jnp.allclose(out, ref, atol=1e-4, rtol=1e-4), (
        f"max abs err {jnp.max(jnp.abs(out - ref))}")

    print("KERNEL_OK")
</pallas_src>

<mosaic_0001>
module attributes {stable_mosaic.version = 11 : i64} {
  func.func @encoder_kernel(%arg0: memref<8x2xf32, #tpu.memory_space<vmem>>, %arg1: memref<2x512xf32, #tpu.memory_space<vmem>>, %arg2: memref<128x512xf32, #tpu.memory_space<vmem>>, %arg3: memref<1x512xf32, #tpu.memory_space<vmem>>, %arg4: memref<128x128xf32, #tpu.memory_space<vmem>>, %arg5: memref<32x128xf32, #tpu.memory_space<vmem>>, %arg6: memref<1x128xf32, #tpu.memory_space<vmem>>, %arg7: memref<1x32xf32, #tpu.memory_space<vmem>>) attributes {dimension_semantics = [], scalar_prefetch = 0 : i64, scratch_operands = 0 : i64, tpu.core_type = #tpu.core_type<tc>} {
    %c0 = arith.constant 0 : index
    %c0_0 = arith.constant 0 : index
    %0 = vector.load %arg2[%c0, %c0_0] : memref<128x512xf32, #tpu.memory_space<vmem>>, vector<128x512xf32>
    %c0_1 = arith.constant 0 : index
    %c0_2 = arith.constant 0 : index
    %1 = vector.load %arg5[%c0_1, %c0_2] : memref<32x128xf32, #tpu.memory_space<vmem>>, vector<32x128xf32>
    %c0_3 = arith.constant 0 : index
    %c0_4 = arith.constant 0 : index
    %2 = vector.load %arg0[%c0_3, %c0_4] : memref<8x2xf32, #tpu.memory_space<vmem>>, vector<8x2xf32>
    %c0_5 = arith.constant 0 : index
    %c0_6 = arith.constant 0 : index
    %3 = vector.load %arg1[%c0_5, %c0_6] : memref<2x512xf32, #tpu.memory_space<vmem>>, vector<2x512xf32>
    %cst = arith.constant dense<0.000000e+00> : vector<8x512xf32>
    %4 = tpu.matmul %2, %3, %cst {dimension_numbers = #tpu.dot_dimension_numbers<[1], [0], [0], [1], [0, 0, 1, 1], [], []>} : vector<8x2xf32>, vector<2x512xf32>, vector<8x512xf32> -> vector<8x512xf32>
    %c0_7 = arith.constant 0 : index
    %c0_8 = arith.constant 0 : index
    %5 = vector.load %arg3[%c0_7, %c0_8] : memref<1x512xf32, #tpu.memory_space<vmem>>, vector<1x512xf32>
    %6 = vector.broadcast %5 : vector<1x512xf32> to vector<8x512xf32>
    %7 = arith.addf %4, %6 : vector<8x512xf32>
    %cst_9 = arith.constant 0.000000e+00 : f32
    %8 = vector.broadcast %cst_9 : f32 to vector<1x128xf32>
    %cst_10 = arith.constant 0.000000e+00 : f32
    %9 = vector.broadcast %cst_10 : f32 to vector<1x128xf32>
    %10 = vector.extract_strided_slice %7 {offsets = [0, 0], sizes = [1, 512], strides = [1, 1]} : vector<8x512xf32> to vector<1x512xf32>
    %cst_11 = arith.constant dense<0.000000e+00> : vector<1x512xf32>
    %11 = tpu.matmul %8, %0, %cst_11 {dimension_numbers = #tpu.dot_dimension_numbers<[1], [0], [0], [1], [0, 0, 1, 1], [], []>} : vector<1x128xf32>, vector<128x512xf32>, vector<1x512xf32> -> vector<1x512xf32>
    %12 = arith.addf %10, %11 : vector<1x512xf32>
    %13 = vector.extract_strided_slice %12 {offsets = [0, 0], sizes = [1, 128], strides = [1, 1]} : vector<1x512xf32> to vector<1x128xf32>
    %14 = arith.negf %13 : vector<1x128xf32>
    %15 = math.exp %14 : vector<1x128xf32>
    %cst_12 = arith.constant 1.000000e+00 : f32
    %16 = vector.broadcast %cst_12 : f32 to vector<1x128xf32>
    %17 = arith.addf %16, %15 : vector<1x128xf32>
    %18 = arith.divf %16, %17 : vector<1x128xf32>
    %19 = vector.extract_strided_slice %12 {offsets = [0, 128], sizes = [1, 128], strides = [1, 1]} : vector<1x512xf32> to vector<1x128xf32>
    %20 = arith.negf %19 : vector<1x128xf32>
    %21 = math.exp %20 : vector<1x128xf32>
    %cst_13 = arith.constant 1.000000e+00 : f32
    %22 = vector.broadcast %cst_13 : f32 to vector<1x128xf32>
    %23 = arith.addf %22, %21 : vector<1x128xf32>
    %24 = arith.divf %22, %23 : vector<1x128xf32>
    %25 = vector.extract_strided_slice %12 {offsets = [0, 256], sizes = [1, 128], strides = [1, 1]} : vector<1x512xf32> to vector<1x128xf32>
    %26 = math.tanh %25 : vector<1x128xf32>
    %27 = vector.extract_strided_slice %12 {offsets = [0, 384], sizes = [1, 128], strides = [1, 1]} : vector<1x512xf32> to vector<1x128xf32>
    %28 = arith.negf %27 : vector<1x128xf32>
    %29 = math.exp %28 : vector<1x128xf32>
    %cst_14 = arith.constant 1.000000e+00 : f32
    %30 = vector.broadcast %cst_14 : f32 to vector<1x128xf32>
    %31 = arith.addf %30, %29 : vector<1x128xf32>
    %32 = arith.divf %30, %31 : vector<1x128xf32>
    %33 = arith.mulf %24, %9 : vector<1x128xf32>
    %34 = arith.mulf %18, %26 : vector<1x128xf32>
    %35 = arith.addf %33, %34 : vector<1x128xf32>
    %36 = math.tanh %35 : vector<1x128xf32>
    %37 = arith.mulf %32, %36 : vector<1x128xf32>
    %38 = vector.extract_strided_slice %7 {offsets = [1, 0], sizes = [1, 512], strides = [1, 1]} : vector<8x512xf32> to vector<1x512xf32>
    %cst_15 = arith.constant dense<0.000000e+00> : vector<1x512xf32>
    %39 = tpu.matmul %37, %0, %cst_15 {dimension_numbers = #tpu.dot_dimension_numbers<[1], [0], [0], [1], [0, 0, 1, 1], [], []>} : vector<1x128xf32>, vector<128x512xf32>, vector<1x512xf32> -> vector<1x512xf32>
    %40 = arith.addf %38, %39 : vector<1x512xf32>
    %41 = vector.extract_strided_slice %40 {offsets = [0, 0], sizes = [1, 128], strides = [1, 1]} : vector<1x512xf32> to vector<1x128xf32>
    %42 = arith.negf %41 : vector<1x128xf32>
    %43 = math.exp %42 : vector<1x128xf32>
    %cst_16 = arith.constant 1.000000e+00 : f32
    %44 = vector.broadcast %cst_16 : f32 to vector<1x128xf32>
    %45 = arith.addf %44, %43 : vector<1x128xf32>
    %46 = arith.divf %44, %45 : vector<1x128xf32>
    %47 = vector.extract_strided_slice %40 {offsets = [0, 128], sizes = [1, 128], strides = [1, 1]} : vector<1x512xf32> to vector<1x128xf32>
    %48 = arith.negf %47 : vector<1x128xf32>
    %49 = math.exp %48 : vector<1x128xf32>
    %cst_17 = arith.constant 1.000000e+00 : f32
    %50 = vector.broadcast %cst_17 : f32 to vector<1x128xf32>
    %51 = arith.addf %50, %49 : vector<1x128xf32>
    %52 = arith.divf %50, %51 : vector<1x128xf32>
    %53 = vector.extract_strided_slice %40 {offsets = [0, 256], sizes = [1, 128], strides = [1, 1]} : vector<1x512xf32> to vector<1x128xf32>
    %54 = math.tanh %53 : vector<1x128xf32>
    %55 = vector.extract_strided_slice %40 {offsets = [0, 384], sizes = [1, 128], strides = [1, 1]} : vector<1x512xf32> to vector<1x128xf32>
    %56 = arith.negf %55 : vector<1x128xf32>
    %57 = math.exp %56 : vector<1x128xf32>
    %cst_18 = arith.constant 1.000000e+00 : f32
    %58 = vector.broadcast %cst_18 : f32 to vector<1x128xf32>
    %59 = arith.addf %58, %57 : vector<1x128xf32>
    %60 = arith.divf %58, %59 : vector<1x128xf32>
    %61 = arith.mulf %52, %35 : vector<1x128xf32>
    %62 = arith.mulf %46, %54 : vector<1x128xf32>
    %63 = arith.addf %61, %62 : vector<1x128xf32>
    %64 = math.tanh %63 : vector<1x128xf32>
    %65 = arith.mulf %60, %64 : vector<1x128xf32>
    %66 = vector.extract_strided_slice %7 {offsets = [2, 0], sizes = [1, 512], strides = [1, 1]} : vector<8x512xf32> to vector<1x512xf32>
    %cst_19 = arith.constant dense<0.000000e+00> : vector<1x512xf32>
    %67 = tpu.matmul %65, %0, %cst_19 {dimension_numbers = #tpu.dot_dimension_numbers<[1], [0], [0], [1], [0, 0, 1, 1], [], []>} : vector<1x128xf32>, vector<128x512xf32>, vector<1x512xf32> -> vector<1x512xf32>
    %68 = arith.addf %66, %67 : vector<1x512xf32>
    %69 = vector.extract_strided_slice %68 {offsets = [0, 0], sizes = [1, 128], strides = [1, 1]} : vector<1x512xf32> to vector<1x128xf32>
    %70 = arith.negf %69 : vector<1x128xf32>
    %71 = math.exp %70 : vector<1x128xf32>
    %cst_20 = arith.constant 1.000000e+00 : f32
    %72 = vector.broadcast %cst_20 : f32 to vector<1x128xf32>
    %73 = arith.addf %72, %71 : vector<1x128xf32>
    %74 = arith.divf %72, %73 : vector<1x128xf32>
    %75 = vector.extract_strided_slice %68 {offsets = [0, 128], sizes = [1, 128], strides = [1, 1]} : vector<1x512xf32> to vector<1x128xf32>
    %76 = arith.negf %75 : vector<1x128xf32>
    %77 = math.exp %76 : vector<1x128xf32>
    %cst_21 = arith.constant 1.000000e+00 : f32
    %78 = vector.broadcast %cst_21 : f32 to vector<1x128xf32>
    %79 = arith.addf %78, %77 : vector<1x128xf32>
    %80 = arith.divf %78, %79 : vector<1x128xf32>
    %81 = vector.extract_strided_slice %68 {offsets = [0, 256], sizes = [1, 128], strides = [1, 1]} : vector<1x512xf32> to vector<1x128xf32>
    %82 = math.tanh %81 : vector<1x128xf32>
    %83 = vector.extract_strided_slice %68 {offsets = [0, 384], sizes = [1, 128], strides = [1, 1]} : vector<1x512xf32> to vector<1x128xf32>
    %84 = arith.negf %83 : vector<1x128xf32>
    %85 = math.exp %84 : vector<1x128xf32>
    %cst_22 = arith.constant 1.000000e+00 : f32
    %86 = vector.broadcast %cst_22 : f32 to vector<1x128xf32>
    %87 = arith.addf %86, %85 : vector<1x128xf32>
    %88 = arith.divf %86, %87 : vector<1x128xf32>
    %89 = arith.mulf %80, %63 : vector<1x128xf32>
    %90 = arith.mulf %74, %82 : vector<1x128xf32>
    %91 = arith.addf %89, %90 : vector<1x128xf32>
    %92 = math.tanh %91 : vector<1x128xf32>
    %93 = arith.mulf %88, %92 : vector<1x128xf32>
    %94 = vector.extract_strided_slice %7 {offsets = [3, 0], sizes = [1, 512], strides = [1, 1]} : vector<8x512xf32> to vector<1x512xf32>
    %cst_23 = arith.constant dense<0.000000e+00> : vector<1x512xf32>
    %95 = tpu.matmul %93, %0, %cst_23 {dimension_numbers = #tpu.dot_dimension_numbers<[1], [0], [0], [1], [0, 0, 1, 1], [], []>} : vector<1x128xf32>, vector<128x512xf32>, vector<1x512xf32> -> vector<1x512xf32>
    %96 = arith.addf %94, %95 : vector<1x512xf32>
    %97 = vector.extract_strided_slice %96 {offsets = [0, 0], sizes = [1, 128], strides = [1, 1]} : vector<1x512xf32> to vector<1x128xf32>
    %98 = arith.negf %97 : vector<1x128xf32>
    %99 = math.exp %98 : vector<1x128xf32>
    %cst_24 = arith.constant 1.000000e+00 : f32
    %100 = vector.broadcast %cst_24 : f32 to vector<1x128xf32>
    %101 = arith.addf %100, %99 : vector<1x128xf32>
    %102 = arith.divf %100, %101 : vector<1x128xf32>
    %103 = vector.extract_strided_slice %96 {offsets = [0, 128], sizes = [1, 128], strides = [1, 1]} : vector<1x512xf32> to vector<1x128xf32>
    %104 = arith.negf %103 : vector<1x128xf32>
    %105 = math.exp %104 : vector<1x128xf32>
    %cst_25 = arith.constant 1.000000e+00 : f32
    %106 = vector.broadcast %cst_25 : f32 to vector<1x128xf32>
    %107 = arith.addf %106, %105 : vector<1x128xf32>
    %108 = arith.divf %106, %107 : vector<1x128xf32>
    %109 = vector.extract_strided_slice %96 {offsets = [0, 256], sizes = [1, 128], strides = [1, 1]} : vector<1x512xf32> to vector<1x128xf32>
    %110 = math.tanh %109 : vector<1x128xf32>
    %111 = vector.extract_strided_slice %96 {offsets = [0, 384], sizes = [1, 128], strides = [1, 1]} : vector<1x512xf32> to vector<1x128xf32>
    %112 = arith.negf %111 : vector<1x128xf32>
    %113 = math.exp %112 : vector<1x128xf32>
    %cst_26 = arith.constant 1.000000e+00 : f32
    %114 = vector.broadcast %cst_26 : f32 to vector<1x128xf32>
    %115 = arith.addf %114, %113 : vector<1x128xf32>
    %116 = arith.divf %114, %115 : vector<1x128xf32>
    %117 = arith.mulf %108, %91 : vector<1x128xf32>
    %118 = arith.mulf %102, %110 : vector<1x128xf32>
    %119 = arith.addf %117, %118 : vector<1x128xf32>
    %120 = math.tanh %119 : vector<1x128xf32>
    %121 = arith.mulf %116, %120 : vector<1x128xf32>
    %122 = vector.extract_strided_slice %7 {offsets = [4, 0], sizes = [1, 512], strides = [1, 1]} : vector<8x512xf32> to vector<1x512xf32>
    %cst_27 = arith.constant dense<0.000000e+00> : vector<1x512xf32>
    %123 = tpu.matmul %121, %0, %cst_27 {dimension_numbers = #tpu.dot_dimension_numbers<[1], [0], [0], [1], [0, 0, 1, 1], [], []>} : vector<1x128xf32>, vector<128x512xf32>, vector<1x512xf32> -> vector<1x512xf32>
    %124 = arith.addf %122, %123 : vector<1x512xf32>
    %125 = vector.extract_strided_slice %124 {offsets = [0, 0], sizes = [1, 128], strides = [1, 1]} : vector<1x512xf32> to vector<1x128xf32>
    %126 = arith.negf %125 : vector<1x128xf32>
    %127 = math.exp %126 : vector<1x128xf32>
    %cst_28 = arith.constant 1.000000e+00 : f32
    %128 = vector.broadcast %cst_28 : f32 to vector<1x128xf32>
    %129 = arith.addf %128, %127 : vector<1x128xf32>
    %130 = arith.divf %128, %129 : vector<1x128xf32>
    %131 = vector.extract_strided_slice %124 {offsets = [0, 128], sizes = [1, 128], strides = [1, 1]} : vector<1x512xf32> to vector<1x128xf32>
    %132 = arith.negf %131 : vector<1x128xf32>
    %133 = math.exp %132 : vector<1x128xf32>
    %cst_29 = arith.constant 1.000000e+00 : f32
    %134 = vector.broadcast %cst_29 : f32 to vector<1x128xf32>
    %135 = arith.addf %134, %133 : vector<1x128xf32>
    %136 = arith.divf %134, %135 : vector<1x128xf32>
    %137 = vector.extract_strided_slice %124 {offsets = [0, 256], sizes = [1, 128], strides = [1, 1]} : vector<1x512xf32> to vector<1x128xf32>
    %138 = math.tanh %137 : vector<1x128xf32>
    %139 = vector.extract_strided_slice %124 {offsets = [0, 384], sizes = [1, 128], strides = [1, 1]} : vector<1x512xf32> to vector<1x128xf32>
    %140 = arith.negf %139 : vector<1x128xf32>
    %141 = math.exp %140 : vector<1x128xf32>
    %cst_30 = arith.constant 1.000000e+00 : f32
    %142 = vector.broadcast %cst_30 : f32 to vector<1x128xf32>
    %143 = arith.addf %142, %141 : vector<1x128xf32>
    %144 = arith.divf %142, %143 : vector<1x128xf32>
    %145 = arith.mulf %136, %119 : vector<1x128xf32>
    %146 = arith.mulf %130, %138 : vector<1x128xf32>
    %147 = arith.addf %145, %146 : vector<1x128xf32>
    %148 = math.tanh %147 : vector<1x128xf32>
    %149 = arith.mulf %144, %148 : vector<1x128xf32>
    %150 = vector.extract_strided_slice %7 {offsets = [5, 0], sizes = [1, 512], strides = [1, 1]} : vector<8x512xf32> to vector<1x512xf32>
    %cst_31 = arith.constant dense<0.000000e+00> : vector<1x512xf32>
    %151 = tpu.matmul %149, %0, %cst_31 {dimension_numbers = #tpu.dot_dimension_numbers<[1], [0], [0], [1], [0, 0, 1, 1], [], []>} : vector<1x128xf32>, vector<128x512xf32>, vector<1x512xf32> -> vector<1x512xf32>
    %152 = arith.addf %150, %151 : vector<1x512xf32>
    %153 = vector.extract_strided_slice %152 {offsets = [0, 0], sizes = [1, 128], strides = [1, 1]} : vector<1x512xf32> to vector<1x128xf32>
    %154 = arith.negf %153 : vector<1x128xf32>
    %155 = math.exp %154 : vector<1x128xf32>
    %cst_32 = arith.constant 1.000000e+00 : f32
    %156 = vector.broadcast %cst_32 : f32 to vector<1x128xf32>
    %157 = arith.addf %156, %155 : vector<1x128xf32>
    %158 = arith.divf %156, %157 : vector<1x128xf32>
    %159 = vector.extract_strided_slice %152 {offsets = [0, 128], sizes = [1, 128], strides = [1, 1]} : vector<1x512xf32> to vector<1x128xf32>
    %160 = arith.negf %159 : vector<1x128xf32>
    %161 = math.exp %160 : vector<1x128xf32>
    %cst_33 = arith.constant 1.000000e+00 : f32
    %162 = vector.broadcast %cst_33 : f32 to vector<1x128xf32>
    %163 = arith.addf %162, %161 : vector<1x128xf32>
    %164 = arith.divf %162, %163 : vector<1x128xf32>
    %165 = vector.extract_strided_slice %152 {offsets = [0, 256], sizes = [1, 128], strides = [1, 1]} : vector<1x512xf32> to vector<1x128xf32>
    %166 = math.tanh %165 : vector<1x128xf32>
    %167 = vector.extract_strided_slice %152 {offsets = [0, 384], sizes = [1, 128], strides = [1, 1]} : vector<1x512xf32> to vector<1x128xf32>
    %168 = arith.negf %167 : vector<1x128xf32>
    %169 = math.exp %168 : vector<1x128xf32>
    %cst_34 = arith.constant 1.000000e+00 : f32
    %170 = vector.broadcast %cst_34 : f32 to vector<1x128xf32>
    %171 = arith.addf %170, %169 : vector<1x128xf32>
    %172 = arith.divf %170, %171 : vector<1x128xf32>
    %173 = arith.mulf %164, %147 : vector<1x128xf32>
    %174 = arith.mulf %158, %166 : vector<1x128xf32>
    %175 = arith.addf %173, %174 : vector<1x128xf32>
    %176 = math.tanh %175 : vector<1x128xf32>
    %177 = arith.mulf %172, %176 : vector<1x128xf32>
    %178 = vector.extract_strided_slice %7 {offsets = [6, 0], sizes = [1, 512], strides = [1, 1]} : vector<8x512xf32> to vector<1x512xf32>
    %cst_35 = arith.constant dense<0.000000e+00> : vector<1x512xf32>
    %179 = tpu.matmul %177, %0, %cst_35 {dimension_numbers = #tpu.dot_dimension_numbers<[1], [0], [0], [1], [0, 0, 1, 1], [], []>} : vector<1x128xf32>, vector<128x512xf32>, vector<1x512xf32> -> vector<1x512xf32>
    %180 = arith.addf %178, %179 : vector<1x512xf32>
    %181 = vector.extract_strided_slice %180 {offsets = [0, 0], sizes = [1, 128], strides = [1, 1]} : vector<1x512xf32> to vector<1x128xf32>
    %182 = arith.negf %181 : vector<1x128xf32>
    %183 = math.exp %182 : vector<1x128xf32>
    %cst_36 = arith.constant 1.000000e+00 : f32
    %184 = vector.broadcast %cst_36 : f32 to vector<1x128xf32>
    %185 = arith.addf %184, %183 : vector<1x128xf32>
    %186 = arith.divf %184, %185 : vector<1x128xf32>
    %187 = vector.extract_strided_slice %180 {offsets = [0, 128], sizes = [1, 128], strides = [1, 1]} : vector<1x512xf32> to vector<1x128xf32>
    %188 = arith.negf %187 : vector<1x128xf32>
    %189 = math.exp %188 : vector<1x128xf32>
    %cst_37 = arith.constant 1.000000e+00 : f32
    %190 = vector.broadcast %cst_37 : f32 to vector<1x128xf32>
    %191 = arith.addf %190, %189 : vector<1x128xf32>
    %192 = arith.divf %190, %191 : vector<1x128xf32>
    %193 = vector.extract_strided_slice %180 {offsets = [0, 256], sizes = [1, 128], strides = [1, 1]} : vector<1x512xf32> to vector<1x128xf32>
    %194 = math.tanh %193 : vector<1x128xf32>
    %195 = vector.extract_strided_slice %180 {offsets = [0, 384], sizes = [1, 128], strides = [1, 1]} : vector<1x512xf32> to vector<1x128xf32>
    %196 = arith.negf %195 : vector<1x128xf32>
    %197 = math.exp %196 : vector<1x128xf32>
    %cst_38 = arith.constant 1.000000e+00 : f32
    %198 = vector.broadcast %cst_38 : f32 to vector<1x128xf32>
    %199 = arith.addf %198, %197 : vector<1x128xf32>
    %200 = arith.divf %198, %199 : vector<1x128xf32>
    %201 = arith.mulf %192, %175 : vector<1x128xf32>
    %202 = arith.mulf %186, %194 : vector<1x128xf32>
    %203 = arith.addf %201, %202 : vector<1x128xf32>
    %204 = math.tanh %203 : vector<1x128xf32>
    %205 = arith.mulf %200, %204 : vector<1x128xf32>
    %206 = vector.extract_strided_slice %7 {offsets = [7, 0], sizes = [1, 512], strides = [1, 1]} : vector<8x512xf32> to vector<1x512xf32>
    %cst_39 = arith.constant dense<0.000000e+00> : vector<1x512xf32>
    %207 = tpu.matmul %205, %0, %cst_39 {dimension_numbers = #tpu.dot_dimension_numbers<[1], [0], [0], [1], [0, 0, 1, 1], [], []>} : vector<1x128xf32>, vector<128x512xf32>, vector<1x512xf32> -> vector<1x512xf32>
    %208 = arith.addf %206, %207 : vector<1x512xf32>
    %209 = vector.extract_strided_slice %208 {offsets = [0, 0], sizes = [1, 128], strides = [1, 1]} : vector<1x512xf32> to vector<1x128xf32>
    %210 = arith.negf %209 : vector<1x128xf32>
    %211 = math.exp %210 : vector<1x128xf32>
    %cst_40 = arith.constant 1.000000e+00 : f32
    %212 = vector.broadcast %cst_40 : f32 to vector<1x128xf32>
    %213 = arith.addf %212, %211 : vector<1x128xf32>
    %214 = arith.divf %212, %213 : vector<1x128xf32>
    %215 = vector.extract_strided_slice %208 {offsets = [0, 128], sizes = [1, 128], strides = [1, 1]} : vector<1x512xf32> to vector<1x128xf32>
    %216 = arith.negf %215 : vector<1x128xf32>
    %217 = math.exp %216 : vector<1x128xf32>
    %cst_41 = arith.constant 1.000000e+00 : f32
    %218 = vector.broadcast %cst_41 : f32 to vector<1x128xf32>
    %219 = arith.addf %218, %217 : vector<1x128xf32>
    %220 = arith.divf %218, %219 : vector<1x128xf32>
    %221 = vector.extract_strided_slice %208 {offsets = [0, 256], sizes = [1, 128], strides = [1, 1]} : vector<1x512xf32> to vector<1x128xf32>
    %222 = math.tanh %221 : vector<1x128xf32>
    %223 = vector.extract_strided_slice %208 {offsets = [0, 384], sizes = [1, 128], strides = [1, 1]} : vector<1x512xf32> to vector<1x128xf32>
    %224 = arith.negf %223 : vector<1x128xf32>
    %225 = math.exp %224 : vector<1x128xf32>
    %cst_42 = arith.constant 1.000000e+00 : f32
    %226 = vector.broadcast %cst_42 : f32 to vector<1x128xf32>
    %227 = arith.addf %226, %225 : vector<1x128xf32>
    %228 = arith.divf %226, %227 : vector<1x128xf32>
    %229 = arith.mulf %220, %203 : vector<1x128xf32>
    %230 = arith.mulf %214, %222 : vector<1x128xf32>
    %231 = arith.addf %229, %230 : vector<1x128xf32>
    %232 = math.tanh %231 : vector<1x128xf32>
    %233 = arith.mulf %228, %232 : vector<1x128xf32>
    %234 = vector.extract_strided_slice %37 {offsets = [0, 0], sizes = [1, 64], strides = [1, 1]} : vector<1x128xf32> to vector<1x64xf32>
    %235 = vector.extract_strided_slice %65 {offsets = [0, 0], sizes = [1, 64], strides = [1, 1]} : vector<1x128xf32> to vector<1x64xf32>
    %236 = vector.extract_strided_slice %93 {offsets = [0, 0], sizes = [1, 64], strides = [1, 1]} : vector<1x128xf32> to vector<1x64xf32>
    %237 = vector.extract_strided_slice %121 {offsets = [0, 0], sizes = [1, 64], strides = [1, 1]} : vector<1x128xf32> to vector<1x64xf32>
    %238 = vector.extract_strided_slice %149 {offsets = [0, 0], sizes = [1, 64], strides = [1, 1]} : vector<1x128xf32> to vector<1x64xf32>
    %239 = vector.extract_strided_slice %177 {offsets = [0, 0], sizes = [1, 64], strides = [1, 1]} : vector<1x128xf32> to vector<1x64xf32>
    %240 = vector.extract_strided_slice %205 {offsets = [0, 0], sizes = [1, 64], strides = [1, 1]} : vector<1x128xf32> to vector<1x64xf32>
    %241 = vector.extract_strided_slice %233 {offsets = [0, 0], sizes = [1, 64], strides = [1, 1]} : vector<1x128xf32> to vector<1x64xf32>
    %242 = tpu.concatenate %234, %235, %236, %237, %238, %239, %240, %241 in 0 : vector<1x64xf32>, vector<1x64xf32>, vector<1x64xf32>, vector<1x64xf32>, vector<1x64xf32>, vector<1x64xf32>, vector<1x64xf32>, vector<1x64xf32> -> vector<8x64xf32>
    %243 = vector.extract_strided_slice %233 {offsets = [0, 64], sizes = [1, 64], strides = [1, 1]} : vector<1x128xf32> to vector<1x64xf32>
    %244 = vector.extract_strided_slice %205 {offsets = [0, 64], sizes = [1, 64], strides = [1, 1]} : vector<1x128xf32> to vector<1x64xf32>
    %245 = vector.extract_strided_slice %177 {offsets = [0, 64], sizes = [1, 64], strides = [1, 1]} : vector<1x128xf32> to vector<1x64xf32>
    %246 = vector.extract_strided_slice %149 {offsets = [0, 64], sizes = [1, 64], strides = [1, 1]} : vector<1x128xf32> to vector<1x64xf32>
    %247 = vector.extract_strided_slice %121 {offsets = [0, 64], sizes = [1, 64], strides = [1, 1]} : vector<1x128xf32> to vector<1x64xf32>
    %248 = vector.extract_strided_slice %93 {offsets = [0, 64], sizes = [1, 64], strides = [1, 1]} : vector<1x128xf32> to vector<1x64xf32>
    %249 = vector.extract_strided_slice %65 {offsets = [0, 64], sizes = [1, 64], strides = [1, 1]} : vector<1x128xf32> to vector<1x64xf32>
    %250 = vector.extract_strided_slice %37 {offsets = [0, 64], sizes = [1, 64], strides = [1, 1]} : vector<1x128xf32> to vector<1x64xf32>
    %251 = tpu.concatenate %243, %244, %245, %246, %247, %248, %249, %250 in 0 : vector<1x64xf32>, vector<1x64xf32>, vector<1x64xf32>, vector<1x64xf32>, vector<1x64xf32>, vector<1x64xf32>, vector<1x64xf32>, vector<1x64xf32> -> vector<8x64xf32>
    %252 = tpu.concatenate %242, %251 in 1 : vector<8x64xf32>, vector<8x64xf32> -> vector<8x128xf32>
    %c0_43 = arith.constant 0 : index
    %c0_44 = arith.constant 0 : index
    %253 = vector.load %arg4[%c0_43, %c0_44] : memref<128x128xf32, #tpu.memory_space<vmem>>, vector<128x128xf32>
    %cst_45 = arith.constant dense<0.000000e+00> : vector<8x128xf32>
    %254 = tpu.matmul %252, %253, %cst_45 {dimension_numbers = #tpu.dot_dimension_numbers<[1], [0], [0], [1], [0, 0, 1, 1], [], []>} : vector<8x128xf32>, vector<128x128xf32>, vector<8x128xf32> -> vector<8x128xf32>
    %c0_46 = arith.constant 0 : index
    %c0_47 = arith.constant 0 : index
    %255 = vector.load %arg6[%c0_46, %c0_47] : memref<1x128xf32, #tpu.memory_space<vmem>>, vector<1x128xf32>
    %256 = vector.broadcast %255 : vector<1x128xf32> to vector<8x128xf32>
    %257 = arith.addf %254, %256 : vector<8x128xf32>
    %cst_48 = arith.constant 0.000000e+00 : f32
    %258 = vector.broadcast %cst_48 : f32 to vector<1x32xf32>
    %cst_49 = arith.constant 0.000000e+00 : f32
    %259 = vector.broadcast %cst_49 : f32 to vector<1x32xf32>
    %260 = vector.extract_strided_slice %257 {offsets = [0, 0], sizes = [1, 128], strides = [1, 1]} : vector<8x128xf32> to vector<1x128xf32>
    %cst_50 = arith.constant dense<0.000000e+00> : vector<1x128xf32>
    %261 = tpu.matmul %258, %1, %cst_50 {dimension_numbers = #tpu.dot_dimension_numbers<[1], [0], [0], [1], [0, 0, 1, 1], [], []>} : vector<1x32xf32>, vector<32x128xf32>, vector<1x128xf32> -> vector<1x128xf32>
    %262 = arith.addf %260, %261 : vector<1x128xf32>
    %263 = vector.extract_strided_slice %262 {offsets = [0, 0], sizes = [1, 32], strides = [1, 1]} : vector<1x128xf32> to vector<1x32xf32>
    %264 = arith.negf %263 : vector<1x32xf32>
    %265 = math.exp %264 : vector<1x32xf32>
    %cst_51 = arith.constant 1.000000e+00 : f32
    %266 = vector.broadcast %cst_51 : f32 to vector<1x32xf32>
    %267 = arith.addf %266, %265 : vector<1x32xf32>
    %268 = arith.divf %266, %267 : vector<1x32xf32>
    %269 = vector.extract_strided_slice %262 {offsets = [0, 32], sizes = [1, 32], strides = [1, 1]} : vector<1x128xf32> to vector<1x32xf32>
    %270 = arith.negf %269 : vector<1x32xf32>
    %271 = math.exp %270 : vector<1x32xf32>
    %cst_52 = arith.constant 1.000000e+00 : f32
    %272 = vector.broadcast %cst_52 : f32 to vector<1x32xf32>
    %273 = arith.addf %272, %271 : vector<1x32xf32>
    %274 = arith.divf %272, %273 : vector<1x32xf32>
    %275 = vector.extract_strided_slice %262 {offsets = [0, 64], sizes = [1, 32], strides = [1, 1]} : vector<1x128xf32> to vector<1x32xf32>
    %276 = math.tanh %275 : vector<1x32xf32>
    %277 = vector.extract_strided_slice %262 {offsets = [0, 96], sizes = [1, 32], strides = [1, 1]} : vector<1x128xf32> to vector<1x32xf32>
    %278 = arith.negf %277 : vector<1x32xf32>
    %279 = math.exp %278 : vector<1x32xf32>
    %cst_53 = arith.constant 1.000000e+00 : f32
    %280 = vector.broadcast %cst_53 : f32 to vector<1x32xf32>
    %281 = arith.addf %280, %279 : vector<1x32xf32>
    %282 = arith.divf %280, %281 : vector<1x32xf32>
    %283 = arith.mulf %274, %259 : vector<1x32xf32>
    %284 = arith.mulf %268, %276 : vector<1x32xf32>
    %285 = arith.addf %283, %284 : vector<1x32xf32>
    %286 = math.tanh %285 : vector<1x32xf32>
    %287 = arith.mulf %282, %286 : vector<1x32xf32>
    %288 = vector.extract_strided_slice %257 {offsets = [1, 0], sizes = [1, 128], strides = [1, 1]} : vector<8x128xf32> to vector<1x128xf32>
    %cst_54 = arith.constant dense<0.000000e+00> : vector<1x128xf32>
    %289 = tpu.matmul %287, %1, %cst_54 {dimension_numbers = #tpu.dot_dimension_numbers<[1], [0], [0], [1], [0, 0, 1, 1], [], []>} : vector<1x32xf32>, vector<32x128xf32>, vector<1x128xf32> -> vector<1x128xf32>
    %290 = arith.addf %288, %289 : vector<1x128xf32>
    %291 = vector.extract_strided_slice %290 {offsets = [0, 0], sizes = [1, 32], strides = [1, 1]} : vector<1x128xf32> to vector<1x32xf32>
    %292 = arith.negf %291 : vector<1x32xf32>
    %293 = math.exp %292 : vector<1x32xf32>
    %cst_55 = arith.constant 1.000000e+00 : f32
    %294 = vector.broadcast %cst_55 : f32 to vector<1x32xf32>
    %295 = arith.addf %294, %293 : vector<1x32xf32>
    %296 = arith.divf %294, %295 : vector<1x32xf32>
    %297 = vector.extract_strided_slice %290 {offsets = [0, 32], sizes = [1, 32], strides = [1, 1]} : vector<1x128xf32> to vector<1x32xf32>
    %298 = arith.negf %297 : vector<1x32xf32>
    %299 = math.exp %298 : vector<1x32xf32>
    %cst_56 = arith.constant 1.000000e+00 : f32
    %300 = vector.broadcast %cst_56 : f32 to vector<1x32xf32>
    %301 = arith.addf %300, %299 : vector<1x32xf32>
    %302 = arith.divf %300, %301 : vector<1x32xf32>
    %303 = vector.extract_strided_slice %290 {offsets = [0, 64], sizes = [1, 32], strides = [1, 1]} : vector<1x128xf32> to vector<1x32xf32>
    %304 = math.tanh %303 : vector<1x32xf32>
    %305 = vector.extract_strided_slice %290 {offsets = [0, 96], sizes = [1, 32], strides = [1, 1]} : vector<1x128xf32> to vector<1x32xf32>
    %306 = arith.negf %305 : vector<1x32xf32>
    %307 = math.exp %306 : vector<1x32xf32>
    %cst_57 = arith.constant 1.000000e+00 : f32
    %308 = vector.broadcast %cst_57 : f32 to vector<1x32xf32>
    %309 = arith.addf %308, %307 : vector<1x32xf32>
    %310 = arith.divf %308, %309 : vector<1x32xf32>
    %311 = arith.mulf %302, %285 : vector<1x32xf32>
    %312 = arith.mulf %296, %304 : vector<1x32xf32>
    %313 = arith.addf %311, %312 : vector<1x32xf32>
    %314 = math.tanh %313 : vector<1x32xf32>
    %315 = arith.mulf %310, %314 : vector<1x32xf32>
    %316 = vector.extract_strided_slice %257 {offsets = [2, 0], sizes = [1, 128], strides = [1, 1]} : vector<8x128xf32> to vector<1x128xf32>
    %cst_58 = arith.constant dense<0.000000e+00> : vector<1x128xf32>
    %317 = tpu.matmul %315, %1, %cst_58 {dimension_numbers = #tpu.dot_dimension_numbers<[1], [0], [0], [1], [0, 0, 1, 1], [], []>} : vector<1x32xf32>, vector<32x128xf32>, vector<1x128xf32> -> vector<1x128xf32>
    %318 = arith.addf %316, %317 : vector<1x128xf32>
    %319 = vector.extract_strided_slice %318 {offsets = [0, 0], sizes = [1, 32], strides = [1, 1]} : vector<1x128xf32> to vector<1x32xf32>
    %320 = arith.negf %319 : vector<1x32xf32>
    %321 = math.exp %320 : vector<1x32xf32>
    %cst_59 = arith.constant 1.000000e+00 : f32
    %322 = vector.broadcast %cst_59 : f32 to vector<1x32xf32>
    %323 = arith.addf %322, %321 : vector<1x32xf32>
    %324 = arith.divf %322, %323 : vector<1x32xf32>
    %325 = vector.extract_strided_slice %318 {offsets = [0, 32], sizes = [1, 32], strides = [1, 1]} : vector<1x128xf32> to vector<1x32xf32>
    %326 = arith.negf %325 : vector<1x32xf32>
    %327 = math.exp %326 : vector<1x32xf32>
    %cst_60 = arith.constant 1.000000e+00 : f32
    %328 = vector.broadcast %cst_60 : f32 to vector<1x32xf32>
    %329 = arith.addf %328, %327 : vector<1x32xf32>
    %330 = arith.divf %328, %329 : vector<1x32xf32>
    %331 = vector.extract_strided_slice %318 {offsets = [0, 64], sizes = [1, 32], strides = [1, 1]} : vector<1x128xf32> to vector<1x32xf32>
    %332 = math.tanh %331 : vector<1x32xf32>
    %333 = vector.extract_strided_slice %318 {offsets = [0, 96], sizes = [1, 32], strides = [1, 1]} : vector<1x128xf32> to vector<1x32xf32>
    %334 = arith.negf %333 : vector<1x32xf32>
    %335 = math.exp %334 : vector<1x32xf32>
    %cst_61 = arith.constant 1.000000e+00 : f32
    %336 = vector.broadcast %cst_61 : f32 to vector<1x32xf32>
    %337 = arith.addf %336, %335 : vector<1x32xf32>
    %338 = arith.divf %336, %337 : vector<1x32xf32>
    %339 = arith.mulf %330, %313 : vector<1x32xf32>
    %340 = arith.mulf %324, %332 : vector<1x32xf32>
    %341 = arith.addf %339, %340 : vector<1x32xf32>
    %342 = math.tanh %341 : vector<1x32xf32>
    %343 = arith.mulf %338, %342 : vector<1x32xf32>
    %344 = vector.extract_strided_slice %257 {offsets = [3, 0], sizes = [1, 128], strides = [1, 1]} : vector<8x128xf32> to vector<1x128xf32>
    %cst_62 = arith.constant dense<0.000000e+00> : vector<1x128xf32>
    %345 = tpu.matmul %343, %1, %cst_62 {dimension_numbers = #tpu.dot_dimension_numbers<[1], [0], [0], [1], [0, 0, 1, 1], [], []>} : vector<1x32xf32>, vector<32x128xf32>, vector<1x128xf32> -> vector<1x128xf32>
    %346 = arith.addf %344, %345 : vector<1x128xf32>
    %347 = vector.extract_strided_slice %346 {offsets = [0, 0], sizes = [1, 32], strides = [1, 1]} : vector<1x128xf32> to vector<1x32xf32>
    %348 = arith.negf %347 : vector<1x32xf32>
    %349 = math.exp %348 : vector<1x32xf32>
    %cst_63 = arith.constant 1.000000e+00 : f32
    %350 = vector.broadcast %cst_63 : f32 to vector<1x32xf32>
    %351 = arith.addf %350, %349 : vector<1x32xf32>
    %352 = arith.divf %350, %351 : vector<1x32xf32>
    %353 = vector.extract_strided_slice %346 {offsets = [0, 32], sizes = [1, 32], strides = [1, 1]} : vector<1x128xf32> to vector<1x32xf32>
    %354 = arith.negf %353 : vector<1x32xf32>
    %355 = math.exp %354 : vector<1x32xf32>
    %cst_64 = arith.constant 1.000000e+00 : f32
    %356 = vector.broadcast %cst_64 : f32 to vector<1x32xf32>
    %357 = arith.addf %356, %355 : vector<1x32xf32>
    %358 = arith.divf %356, %357 : vector<1x32xf32>
    %359 = vector.extract_strided_slice %346 {offsets = [0, 64], sizes = [1, 32], strides = [1, 1]} : vector<1x128xf32> to vector<1x32xf32>
    %360 = math.tanh %359 : vector<1x32xf32>
    %361 = vector.extract_strided_slice %346 {offsets = [0, 96], sizes = [1, 32], strides = [1, 1]} : vector<1x128xf32> to vector<1x32xf32>
    %362 = arith.negf %361 : vector<1x32xf32>
    %363 = math.exp %362 : vector<1x32xf32>
    %cst_65 = arith.constant 1.000000e+00 : f32
    %364 = vector.broadcast %cst_65 : f32 to vector<1x32xf32>
    %365 = arith.addf %364, %363 : vector<1x32xf32>
    %366 = arith.divf %364, %365 : vector<1x32xf32>
    %367 = arith.mulf %358, %341 : vector<1x32xf32>
    %368 = arith.mulf %352, %360 : vector<1x32xf32>
    %369 = arith.addf %367, %368 : vector<1x32xf32>
    %370 = math.tanh %369 : vector<1x32xf32>
    %371 = arith.mulf %366, %370 : vector<1x32xf32>
    %372 = vector.extract_strided_slice %257 {offsets = [4, 0], sizes = [1, 128], strides = [1, 1]} : vector<8x128xf32> to vector<1x128xf32>
    %cst_66 = arith.constant dense<0.000000e+00> : vector<1x128xf32>
    %373 = tpu.matmul %371, %1, %cst_66 {dimension_numbers = #tpu.dot_dimension_numbers<[1], [0], [0], [1], [0, 0, 1, 1], [], []>} : vector<1x32xf32>, vector<32x128xf32>, vector<1x128xf32> -> vector<1x128xf32>
    %374 = arith.addf %372, %373 : vector<1x128xf32>
    %375 = vector.extract_strided_slice %374 {offsets = [0, 0], sizes = [1, 32], strides = [1, 1]} : vector<1x128xf32> to vector<1x32xf32>
    %376 = arith.negf %375 : vector<1x32xf32>
    %377 = math.exp %376 : vector<1x32xf32>
    %cst_67 = arith.constant 1.000000e+00 : f32
    %378 = vector.broadcast %cst_67 : f32 to vector<1x32xf32>
    %379 = arith.addf %378, %377 : vector<1x32xf32>
    %380 = arith.divf %378, %379 : vector<1x32xf32>
    %381 = vector.extract_strided_slice %374 {offsets = [0, 32], sizes = [1, 32], strides = [1, 1]} : vector<1x128xf32> to vector<1x32xf32>
    %382 = arith.negf %381 : vector<1x32xf32>
    %383 = math.exp %382 : vector<1x32xf32>
    %cst_68 = arith.constant 1.000000e+00 : f32
    %384 = vector.broadcast %cst_68 : f32 to vector<1x32xf32>
    %385 = arith.addf %384, %383 : vector<1x32xf32>
    %386 = arith.divf %384, %385 : vector<1x32xf32>
    %387 = vector.extract_strided_slice %374 {offsets = [0, 64], sizes = [1, 32], strides = [1, 1]} : vector<1x128xf32> to vector<1x32xf32>
    %388 = math.tanh %387 : vector<1x32xf32>
    %389 = vector.extract_strided_slice %374 {offsets = [0, 96], sizes = [1, 32], strides = [1, 1]} : vector<1x128xf32> to vector<1x32xf32>
    %390 = arith.negf %389 : vector<1x32xf32>
    %391 = math.exp %390 : vector<1x32xf32>
    %cst_69 = arith.constant 1.000000e+00 : f32
    %392 = vector.broadcast %cst_69 : f32 to vector<1x32xf32>
    %393 = arith.addf %392, %391 : vector<1x32xf32>
    %394 = arith.divf %392, %393 : vector<1x32xf32>
    %395 = arith.mulf %386, %369 : vector<1x32xf32>
    %396 = arith.mulf %380, %388 : vector<1x32xf32>
    %397 = arith.addf %395, %396 : vector<1x32xf32>
    %398 = math.tanh %397 : vector<1x32xf32>
    %399 = arith.mulf %394, %398 : vector<1x32xf32>
    %400 = vector.extract_strided_slice %257 {offsets = [5, 0], sizes = [1, 128], strides = [1, 1]} : vector<8x128xf32> to vector<1x128xf32>
    %cst_70 = arith.constant dense<0.000000e+00> : vector<1x128xf32>
    %401 = tpu.matmul %399, %1, %cst_70 {dimension_numbers = #tpu.dot_dimension_numbers<[1], [0], [0], [1], [0, 0, 1, 1], [], []>} : vector<1x32xf32>, vector<32x128xf32>, vector<1x128xf32> -> vector<1x128xf32>
    %402 = arith.addf %400, %401 : vector<1x128xf32>
    %403 = vector.extract_strided_slice %402 {offsets = [0, 0], sizes = [1, 32], strides = [1, 1]} : vector<1x128xf32> to vector<1x32xf32>
    %404 = arith.negf %403 : vector<1x32xf32>
    %405 = math.exp %404 : vector<1x32xf32>
    %cst_71 = arith.constant 1.000000e+00 : f32
    %406 = vector.broadcast %cst_71 : f32 to vector<1x32xf32>
    %407 = arith.addf %406, %405 : vector<1x32xf32>
    %408 = arith.divf %406, %407 : vector<1x32xf32>
    %409 = vector.extract_strided_slice %402 {offsets = [0, 32], sizes = [1, 32], strides = [1, 1]} : vector<1x128xf32> to vector<1x32xf32>
    %410 = arith.negf %409 : vector<1x32xf32>
    %411 = math.exp %410 : vector<1x32xf32>
    %cst_72 = arith.constant 1.000000e+00 : f32
    %412 = vector.broadcast %cst_72 : f32 to vector<1x32xf32>
    %413 = arith.addf %412, %411 : vector<1x32xf32>
    %414 = arith.divf %412, %413 : vector<1x32xf32>
    %415 = vector.extract_strided_slice %402 {offsets = [0, 64], sizes = [1, 32], strides = [1, 1]} : vector<1x128xf32> to vector<1x32xf32>
    %416 = math.tanh %415 : vector<1x32xf32>
    %417 = vector.extract_strided_slice %402 {offsets = [0, 96], sizes = [1, 32], strides = [1, 1]} : vector<1x128xf32> to vector<1x32xf32>
    %418 = arith.negf %417 : vector<1x32xf32>
    %419 = math.exp %418 : vector<1x32xf32>
    %cst_73 = arith.constant 1.000000e+00 : f32
    %420 = vector.broadcast %cst_73 : f32 to vector<1x32xf32>
    %421 = arith.addf %420, %419 : vector<1x32xf32>
    %422 = arith.divf %420, %421 : vector<1x32xf32>
    %423 = arith.mulf %414, %397 : vector<1x32xf32>
    %424 = arith.mulf %408, %416 : vector<1x32xf32>
    %425 = arith.addf %423, %424 : vector<1x32xf32>
    %426 = math.tanh %425 : vector<1x32xf32>
    %427 = arith.mulf %422, %426 : vector<1x32xf32>
    %428 = vector.extract_strided_slice %257 {offsets = [6, 0], sizes = [1, 128], strides = [1, 1]} : vector<8x128xf32> to vector<1x128xf32>
    %cst_74 = arith.constant dense<0.000000e+00> : vector<1x128xf32>
    %429 = tpu.matmul %427, %1, %cst_74 {dimension_numbers = #tpu.dot_dimension_numbers<[1], [0], [0], [1], [0, 0, 1, 1], [], []>} : vector<1x32xf32>, vector<32x128xf32>, vector<1x128xf32> -> vector<1x128xf32>
    %430 = arith.addf %428, %429 : vector<1x128xf32>
    %431 = vector.extract_strided_slice %430 {offsets = [0, 0], sizes = [1, 32], strides = [1, 1]} : vector<1x128xf32> to vector<1x32xf32>
    %432 = arith.negf %431 : vector<1x32xf32>
    %433 = math.exp %432 : vector<1x32xf32>
    %cst_75 = arith.constant 1.000000e+00 : f32
    %434 = vector.broadcast %cst_75 : f32 to vector<1x32xf32>
    %435 = arith.addf %434, %433 : vector<1x32xf32>
    %436 = arith.divf %434, %435 : vector<1x32xf32>
    %437 = vector.extract_strided_slice %430 {offsets = [0, 32], sizes = [1, 32], strides = [1, 1]} : vector<1x128xf32> to vector<1x32xf32>
    %438 = arith.negf %437 : vector<1x32xf32>
    %439 = math.exp %438 : vector<1x32xf32>
    %cst_76 = arith.constant 1.000000e+00 : f32
    %440 = vector.broadcast %cst_76 : f32 to vector<1x32xf32>
    %441 = arith.addf %440, %439 : vector<1x32xf32>
    %442 = arith.divf %440, %441 : vector<1x32xf32>
    %443 = vector.extract_strided_slice %430 {offsets = [0, 64], sizes = [1, 32], strides = [1, 1]} : vector<1x128xf32> to vector<1x32xf32>
    %444 = math.tanh %443 : vector<1x32xf32>
    %445 = vector.extract_strided_slice %430 {offsets = [0, 96], sizes = [1, 32], strides = [1, 1]} : vector<1x128xf32> to vector<1x32xf32>
    %446 = arith.negf %445 : vector<1x32xf32>
    %447 = math.exp %446 : vector<1x32xf32>
    %cst_77 = arith.constant 1.000000e+00 : f32
    %448 = vector.broadcast %cst_77 : f32 to vector<1x32xf32>
    %449 = arith.addf %448, %447 : vector<1x32xf32>
    %450 = arith.divf %448, %449 : vector<1x32xf32>
    %451 = arith.mulf %442, %425 : vector<1x32xf32>
    %452 = arith.mulf %436, %444 : vector<1x32xf32>
    %453 = arith.addf %451, %452 : vector<1x32xf32>
    %454 = math.tanh %453 : vector<1x32xf32>
    %455 = arith.mulf %450, %454 : vector<1x32xf32>
    %456 = vector.extract_strided_slice %257 {offsets = [7, 0], sizes = [1, 128], strides = [1, 1]} : vector<8x128xf32> to vector<1x128xf32>
    %cst_78 = arith.constant dense<0.000000e+00> : vector<1x128xf32>
    %457 = tpu.matmul %455, %1, %cst_78 {dimension_numbers = #tpu.dot_dimension_numbers<[1], [0], [0], [1], [0, 0, 1, 1], [], []>} : vector<1x32xf32>, vector<32x128xf32>, vector<1x128xf32> -> vector<1x128xf32>
    %458 = arith.addf %456, %457 : vector<1x128xf32>
    %459 = vector.extract_strided_slice %458 {offsets = [0, 0], sizes = [1, 32], strides = [1, 1]} : vector<1x128xf32> to vector<1x32xf32>
    %460 = arith.negf %459 : vector<1x32xf32>
    %461 = math.exp %460 : vector<1x32xf32>
    %cst_79 = arith.constant 1.000000e+00 : f32
    %462 = vector.broadcast %cst_79 : f32 to vector<1x32xf32>
    %463 = arith.addf %462, %461 : vector<1x32xf32>
    %464 = arith.divf %462, %463 : vector<1x32xf32>
    %465 = vector.extract_strided_slice %458 {offsets = [0, 32], sizes = [1, 32], strides = [1, 1]} : vector<1x128xf32> to vector<1x32xf32>
    %466 = arith.negf %465 : vector<1x32xf32>
    %467 = math.exp %466 : vector<1x32xf32>
    %cst_80 = arith.constant 1.000000e+00 : f32
    %468 = vector.broadcast %cst_80 : f32 to vector<1x32xf32>
    %469 = arith.addf %468, %467 : vector<1x32xf32>
    %470 = arith.divf %468, %469 : vector<1x32xf32>
    %471 = vector.extract_strided_slice %458 {offsets = [0, 64], sizes = [1, 32], strides = [1, 1]} : vector<1x128xf32> to vector<1x32xf32>
    %472 = math.tanh %471 : vector<1x32xf32>
    %473 = vector.extract_strided_slice %458 {offsets = [0, 96], sizes = [1, 32], strides = [1, 1]} : vector<1x128xf32> to vector<1x32xf32>
    %474 = arith.negf %473 : vector<1x32xf32>
    %475 = math.exp %474 : vector<1x32xf32>
    %cst_81 = arith.constant 1.000000e+00 : f32
    %476 = vector.broadcast %cst_81 : f32 to vector<1x32xf32>
    %477 = arith.addf %476, %475 : vector<1x32xf32>
    %478 = arith.divf %476, %477 : vector<1x32xf32>
    %479 = arith.mulf %470, %453 : vector<1x32xf32>
    %480 = arith.mulf %464, %472 : vector<1x32xf32>
    %481 = arith.addf %479, %480 : vector<1x32xf32>
    %482 = math.tanh %481 : vector<1x32xf32>
    %483 = arith.mulf %478, %482 : vector<1x32xf32>
    %c0_82 = arith.constant 0 : index
    %c0_83 = arith.constant 0 : index
    %484 = vector.load %arg7[%c0_82, %c0_83] : memref<1x32xf32, #tpu.memory_space<vmem>>, vector<1x32xf32>
    tpu.vector_store %arg7[%c0_82, %c0_83], %483 {strides = array<i32>} : memref<1x32xf32, #tpu.memory_space<vmem>>, vector<1x32xf32>,
    return
  }
}

</mosaic_0001>

<bundles_post_ra>
// kernel: tpu_custom_call.1
= control target key start
LH: loop header
LB: loop body
LE: loop exit
PB: predicated region body
PF: predicated region fallthrough
CT: control target
= control target key end

     0   :  { %12 = vsyncpa [#allocation3], 0  ;;  %s4646_s0 = inlined_call_operand.vmem [shape: f32[8,2], index: 0, kind: input, shape index: {}]   ;;  %s4647_s1 = inlined_call_operand.vmem [shape: f32[2,512], index: 1, kind: input, shape index: {}]   ;;  %s4648_s2 = inlined_call_operand.hbm [shape: f32[128,512], index: 2, kind: input, shape index: {}]   ;;  %s4649_s3 = inlined_call_operand.vmem [shape: f32[1,512], index: 3, kind: input, shape index: {}]   ;;  %s4650_s4 = inlined_call_operand.hbm [shape: f32[128,128], index: 4, kind: input, shape index: {}]   ;;  %s4651_s5 = inlined_call_operand.hbm [shape: f32[32,128], index: 5, kind: input, shape index: {}]   ;;  %s4652_s6 = inlined_call_operand.vmem [shape: f32[1,128], index: 6, kind: input, shape index: {}]   ;;  %s4653_s7 = inlined_call_operand.hbm [shape: f32[1,32], index: 7, kind: output, shape index: {}]  }
   0x1   :  { %13 = vsyncpa [#allocation6], 0 }
   0x2   :  { %14 = vsyncpa [#allocation4], 0  ;;  %s3928_s24 = smov [#allocation5]   ;;  %s3834_s28 = scalar_lea.hbm %s4650_s4, 2048 }
   0x3   :  { %s38_s25 = sshll.u32 %s3928_s24, 4  ;;  %p3835_p0 = scmp.ne.s32.totalorder %s4650_s4, %s3834_s28  ;;  %s39_s25 = int_to_ptr.vmem [resolvable:$true] %s38_s25 }
   0x4   :  { %p3838_p1 = scmp.lt.u32.totalorder %s3834_s28, %s4650_s4 }
   0x6   :  { %p3840_p2 = pnand %p3838_p1, %p3835_p0 }
   0x8   :  { %3843 = shalt.err (!%p3840_p2)
}
   0x9   :  { %s3844_s10 = scalar_lea.vmem %s39_s25, 2048  ;;  %p3849_p4 = scmp.lt.s32.totalorder %s39_s25, %s39_s25 }
   0xa   :  { %p3845_p3 = scmp.ne.s32.totalorder %s39_s25, %s3844_s10  ;;  %p3850_p5 = scmp.lt.s32.totalorder %s3844_s10, %s3844_s10 }
   0xc   :  { %p3851_p6 = por %p3850_p5, %p3849_p4 }
   0xe   :  { %p3852_p7 = pnand %p3851_p6, %p3845_p3 }
  0x10   :  { %3855 = shalt.err (!%p3852_p7)
}
  0x11   :  { %s3929_s11 = smov 128   ;;  %s3930_s12 = smov 8  }
  0x12   :  { %44 = dma.hbm_to_vmem [thread:$0]  %s4650_s4, 2048, %s39_s25, [#allocation6], %s3929_s11, %s3929_s11, %s3930_s12  }
  0x13   :  { %s3931_s15 = smov [#allocation2]   ;;  %s3856_s19 = scalar_lea.hbm %s4648_s2, 8192 }
  0x14   :  { %s24_s16 = sshll.u32 %s3931_s15, 4  ;;  %p3857_p8 = scmp.ne.s32.totalorder %s4648_s2, %s3856_s19  ;;  %s25_s16 = int_to_ptr.vmem [resolvable:$true] %s24_s16 }
  0x15   :  { %p3860_p9 = scmp.lt.u32.totalorder %s3856_s19, %s4648_s2 }
  0x17   :  { %p3862_p10 = pnand %p3860_p9, %p3857_p8 }
  0x19   :  { %3865 = shalt.err (!%p3862_p10)
}
  0x1a   :  { %s3866_s24 = scalar_lea.vmem %s25_s16, 8192  ;;  %p3871_p12 = scmp.lt.s32.totalorder %s25_s16, %s25_s16 }
  0x1b   :  { %p3867_p11 = scmp.ne.s32.totalorder %s25_s16, %s3866_s24  ;;  %p3872_p13 = scmp.lt.s32.totalorder %s3866_s24, %s3866_s24 }
  0x1d   :  { %p3873_p0 = por %p3872_p13, %p3871_p12 }
  0x1f   :  { %p3874_p1 = pnand %p3873_p0, %p3867_p11 }
  0x21   :  { %3877 = shalt.err (!%p3874_p1)
}
  0x22   :  { %s3932_s4 = smov 512   ;;  %s3933_s25 = smov 32  }
  0x23   :  { %30 = dma.hbm_to_vmem [thread:$0]  %s4648_s2, 8192, %s25_s16, [#allocation3], %s3932_s4, %s3932_s4, %s3933_s25  }
  0x24   :  { %s3934_s28 = smov [#allocation7]   ;;  %s3878_s9 = scalar_lea.hbm %s4651_s5, 512 }
  0x25   :  { %s50_s29 = sshll.u32 %s3934_s28, 4  ;;  %p3879_p2 = scmp.ne.s32.totalorder %s4651_s5, %s3878_s9  ;;  %s51_s29 = int_to_ptr.vmem [resolvable:$true] %s50_s29 }
  0x26   :  { %p3882_p3 = scmp.lt.u32.totalorder %s3878_s9, %s4651_s5 }
  0x28   :  { %p3884_p4 = pnand %p3882_p3, %p3879_p2 }
  0x2a   :  { %3887 = shalt.err (!%p3884_p4)
}
  0x2b   :  { %s3888_s17 = scalar_lea.vmem %s51_s29, 512  ;;  %p3893_p6 = scmp.lt.s32.totalorder %s51_s29, %s51_s29 }
  0x2c   :  { %p3889_p5 = scmp.ne.s32.totalorder %s51_s29, %s3888_s17  ;;  %p3894_p7 = scmp.lt.s32.totalorder %s3888_s17, %s3888_s17 }
  0x2e   :  { %p3895_p8 = por %p3894_p7, %p3893_p6 }
  0x30   :  { %p3896_p9 = pnand %p3895_p8, %p3889_p5 }
  0x32   :  { %3899 = shalt.err (!%p3896_p9)
}
  0x33   :  { %56 = dma.hbm_to_vmem [thread:$0]  %s4651_s5, 512, %s51_s29, [#allocation6], %s3929_s11, %s3929_s11, %s3930_s12  }
  0x34   :  { %3922 = dma.done.wait [#allocation3], 8192  }
  0x35   :  { %3923 = vsyncadd [#allocation3], 4294959104 }
  0x36   :  { %3924 = dma.done.wait [#allocation6], 2560  }
  0x37   :  { %3925 = vsyncadd [#allocation6], 4294964736  ;;  %v140_v0 = vlaneseq  ;;  %v3935_v1 = vmov 1983009808   ;;  %v3936_v3 = vmov 0.0   ;;  %v137_v7 = vld [vmem:[%s4647_s1] sm:$0xff] }
  0x38   :  { %v163_v2 = vunpack.c.l.s4 %v3935_v1  ;;  %255 = vmatprep.mubr.f32.mxu0 %v3936_v3  ;;  %326 = vmatprep.mubr.f32.mxu1 %v3936_v3  ;;  %v161_v9 = vcombine.high %v137_v7, %v137_v7  ;;  %v69_v10 = vld [vmem:[#allocation2 + $0x8] sm:$0xff]  ;;  %v68_v12 = vld [vmem:[#allocation2] sm:$0xff]  ;;  %vm182_vm0 = vcmask 1041408   ;;  %v71_v14 = vld [vmem:[#allocation2 + $0x18] sm:$0xff]  ;;  %vm178_vm1 = vcmask 15360   ;;  %s3939_s20 = smov 64  }
  0x39   :  { %v4026_v4 = vshrl.u32 %v140_v0, 7  ;;  %v73_v11 = vld [vmem:[#allocation2 + $0x28] sm:$0xff]  ;;  %v72_v13 = vld [vmem:[#allocation2 + $0x20] sm:$0xff]  ;;  %v75_v15 = vld [vmem:[#allocation2 + $0x38] sm:$0xff]  ;;  %vm1816_vm2 = vcmask 1040384   ;;  %vm1819_vm3 = vcmask 1042432  }
  0x3a   :  { %v164_v5 = vunpack.c.0.s8 %v163_v2  ;;  %v77_v18 = vld [vmem:[#allocation2 + $0x48] sm:$0xff]  ;;  %v136_v20 = vld [vmem:[%s4646_s0] sm:$0xff]  ;;  %v4035_v21 = vpack.c.bf16 %v73_v11, %v69_v10  ;;  %v70_v22 = vld [vmem:[#allocation2 + $0x10] sm:$0xff]  ;;  %v4038_v25 = vpack.c.bf16 %v72_v13, %v68_v12  ;;  %v4040_v26 = vpack.c.bf16 %v75_v15, %v71_v14 }
  0x3b   :  { %v81_v19 = vld [vmem:[#allocation2 + $0x68] sm:$0xff]  ;;  %v74_v23 = vld [vmem:[#allocation2 + $0x30] sm:$0xff]  ;;  %v79_v27 = vld [vmem:[#allocation2 + $0x58] sm:$0xff]  ;;  %vm1821_vm4 = vcmask 1043456   ;;  %vm1823_vm5 = vcmask 1044480   ;;  %vm1825_vm6 = vcmask 1045504  }
  0x3c   :  { %v167_v6 = vsub.s32 %v164_v5, %v4026_v4  ;;  %v83_v28 = vld [vmem:[#allocation2 + $0x78] sm:$0xff]  ;;  %v4043_v29 = vpack.c.bf16 %v81_v19, %v77_v18  ;;  %v76_v30 = vld [vmem:[#allocation2 + $0x40] sm:$0xff]  ;;  %v4047_v32 = vpack.c.bf16 %v74_v23, %v70_v22  ;;  %v85_v33 = vld [vmem:[#allocation2 + $0x88] sm:$0xff]  ;;  %vm3938_vm7 = vmmov 0  }
  0x3d   :  { %v80_v31 = vld [vmem:[#allocation2 + $0x60] sm:$0xff]  ;;  %v89_v34 = vld [vmem:[#allocation2 + $0xa8] sm:$0xff]  ;;  %v4051_v35 = vpack.c.bf16 %v83_v28, %v79_v27  ;;  %v78_v36 = vld [vmem:[#allocation2 + $0x50] sm:$0xff]  ;;  %vm1827_vm8 = vcmask 1046528   ;;  %vm1854_vm9 = vcmask 523264   ;;  %vm1949_vm10 = vcmask 261120  }
  0x3e   :  { %v168_v8 = vrot.slane %v137_v7, %v167_v6  ;;  %v175_v17 = vrot.slane %v161_v9, %v167_v6  ;;  %v82_v37 = vld [vmem:[#allocation2 + $0x70] sm:$0xff]  ;;  %v4055_v38 = vpack.c.bf16 %v80_v31, %v76_v30  ;;  %v87_v39 = vld [vmem:[#allocation2 + $0x98] sm:$0xff]  ;;  %v4059_v41 = vpack.c.bf16 %v89_v34, %v85_v33  ;;  %v84_v42 = vld [vmem:[#allocation2 + $0x80] sm:$0xff] }
  0x3f   :  { %v91_v40 = vld [vmem:[#allocation2 + $0xb8] sm:$0xff]  ;;  %v88_v43 = vld [vmem:[#allocation2 + $0xa0] sm:$0xff]  ;;  %v4062_v44 = vpack.c.bf16 %v82_v37, %v78_v36  ;;  %v93_v45 = vld [vmem:[#allocation2 + $0xc8] sm:$0xff]  ;;  %vm2800_vm11 = vcmask 261127  }
  0x40   :  { %v176_v16 = vcombine.high %v168_v8, %v168_v8  ;;  %v177_v24 = vcombine.high %v175_v17, %v175_v17  ;;  %v97_v46 = vld [vmem:[#allocation2 + $0xe8] sm:$0xff]  ;;  %v4066_v47 = vpack.c.bf16 %v91_v40, %v87_v39  ;;  %v86_v48 = vld [vmem:[#allocation2 + $0x90] sm:$0xff]  ;;  %v4070_v50 = vpack.c.bf16 %v88_v43, %v84_v42  ;;  %v95_v51 = vld [vmem:[#allocation2 + $0xd8] sm:$0xff] }
  0x41   :  { %v90_v49 = vld [vmem:[#allocation2 + $0xb0] sm:$0xff]  ;;  %v99_v52 = vld [vmem:[#allocation2 + $0xf8] sm:$0xff]  ;;  %v4073_v53 = vpack.c.bf16 %v97_v46, %v93_v45  ;;  %v92_v54 = vld [vmem:[#allocation2 + $0xc0] sm:$0xff] }
  0x42   :  { %2818 = vmatprep.subr.msk.mxu0 %vm182_vm0, %v176_v16  ;;  %2821 = vmatprep.subr.msk.mxu1 %vm182_vm0, %v177_v24  ;;  %v96_v55 = vld [vmem:[#allocation2 + $0xe0] sm:$0xff]  ;;  %v4076_v56 = vpack.c.bf16 %v90_v49, %v86_v48  ;;  %v101_v57 = vld [vmem:[#allocation2 + $0x108] sm:$0xff]  ;;  %v4079_v59 = vpack.c.bf16 %v99_v52, %v95_v51  ;;  %v94_v60 = vld [vmem:[#allocation2 + $0xd0] sm:$0xff] }
  0x43   :  { %2819 = vmatpush1.msk.msra.mxu0 %vm182_vm0, %v168_v8  ;;  %2822 = vmatpush1.msk.msra.mxu1 %vm182_vm0, %v175_v17  ;;  %v105_v58 = vld [vmem:[#allocation2 + $0x128] sm:$0xff]  ;;  %v98_v61 = vld [vmem:[#allocation2 + $0xf0] sm:$0xff]  ;;  %v4082_v62 = vpack.c.bf16 %v96_v55, %v92_v54  ;;  %v103_v63 = vld [vmem:[#allocation2 + $0x118] sm:$0xff] }
  0x44   :  { %2820 = vmatmul.mubr.msk.f32.vlgmr.msra.gmra.mrb[0].mxu0 %vm178_vm1, %v136_v20  ;;  %3045 = vmatprep.subr.bf16.mxu0 %v4035_v21  ;;  %v107_v0 = vld [vmem:[#allocation2 + $0x138] sm:$0xff]  ;;  %v4085_v1 = vpack.c.bf16 %v105_v58, %v101_v57  ;;  %v100_v2 = vld [vmem:[#allocation2 + $0x100] sm:$0xff]  ;;  %v4088_v6 = vpack.c.bf16 %v98_v61, %v94_v60  ;;  %v109_v7 = vld [vmem:[#allocation2 + $0x148] sm:$0xff] }
  0x45   :  { %3047 = vmatpush1.bf16.msra.mxu0 %v4038_v25  ;;  %3077 = vmatprep.subr.bf16.mxu1 %v4040_v26  ;;  %v104_v5 = vld [vmem:[#allocation2 + $0x120] sm:$0xff]  ;;  %v113_v8 = vld [vmem:[#allocation2 + $0x168] sm:$0xff]  ;;  %v4091_v9 = vpack.c.bf16 %v107_v0, %v103_v63  ;;  %v102_v10 = vld [vmem:[#allocation2 + $0x110] sm:$0xff] }
  0x46   :  { %2823 = vmatmul.mubr.msk.f32.vlgmr.msra.gmra.mrb[0].mxu1 %vm178_vm1, %v136_v20  ;;  %3049 = vmatprep.subr.bf16.mxu0 %v4043_v29  ;;  %v106_v11 = vld [vmem:[#allocation2 + $0x130] sm:$0xff]  ;;  %v4094_v12 = vpack.c.bf16 %v104_v5, %v100_v2  ;;  %v111_v13 = vld [vmem:[#allocation2 + $0x158] sm:$0xff]  ;;  %v4097_v15 = vpack.c.bf16 %v113_v8, %v109_v7  ;;  %v108_v16 = vld [vmem:[#allocation2 + $0x140] sm:$0xff]  ;;  %v142_v7 = vsub.s32 0, %v4026_v4 }
  0x47   :  { %3079 = vmatpush1.bf16.msra.mxu1 %v4047_v32  ;;  %397 = vmatprep.mubr.f32.mxu0 %v3936_v3  ;;  %v115_v14 = vld [vmem:[#allocation2 + $0x178] sm:$0xff]  ;;  %v112_v17 = vld [vmem:[#allocation2 + $0x160] sm:$0xff]  ;;  %v4100_v18 = vpack.c.bf16 %v106_v11, %v102_v10  ;;  %v117_v19 = vld [vmem:[#allocation2 + $0x188] sm:$0xff]  ;;  %v146_v10 = vsub.s32 1, %v4026_v4 }
  0x48   :  { %3081 = vmatprep.subr.bf16.mxu1 %v4051_v35  ;;  %468 = vmatprep.mubr.f32.mxu1 %v3936_v3  ;;  %v121_v20 = vld [vmem:[#allocation2 + $0x1a8] sm:$0xff]  ;;  %v4103_v22 = vpack.c.bf16 %v115_v14, %v111_v13  ;;  %v110_v23 = vld [vmem:[#allocation2 + $0x150] sm:$0xff]  ;;  %v4106_v27 = vpack.c.bf16 %v112_v17, %v108_v16  ;;  %v119_v28 = vld [vmem:[#allocation2 + $0x198] sm:$0xff]  ;;  %v154_v14 = vsub.s32 3, %v4026_v4 }
  0x49   :  { %3051 = vmatpush1.bf16.msra.mxu0 %v4055_v38  ;;  %v114_v24 = vld [vmem:[#allocation2 + $0x170] sm:$0xff]  ;;  %v123_v30 = vld [vmem:[#allocation2 + $0x1b8] sm:$0xff]  ;;  %v4109_v31 = vpack.c.bf16 %v121_v20, %v117_v19  ;;  %v116_v33 = vld [vmem:[#allocation2 + $0x180] sm:$0xff] }
  0x4a   :  { %3053 = vmatprep.subr.bf16.mxu0 %v4059_v41  ;;  %v120_v34 = vld [vmem:[#allocation2 + $0x1a0] sm:$0xff]  ;;  %v4112_v36 = vpack.c.bf16 %v114_v24, %v110_v23  ;;  %v125_v37 = vld [vmem:[#allocation2 + $0x1c8] sm:$0xff]  ;;  %v4115_v40 = vpack.c.bf16 %v123_v30, %v119_v28  ;;  %v118_v42 = vld [vmem:[#allocation2 + $0x190] sm:$0xff] }
  0x4b   :  { %3083 = vmatpush1.bf16.msra.mxu1 %v4062_v44  ;;  %v129_v39 = vld [vmem:[#allocation2 + $0x1e8] sm:$0xff]  ;;  %v122_v43 = vld [vmem:[#allocation2 + $0x1b0] sm:$0xff]  ;;  %v4118_v45 = vpack.c.bf16 %v120_v34, %v116_v33  ;;  %v127_v46 = vld [vmem:[#allocation2 + $0x1d8] sm:$0xff]  ;;  %v150_v33 = vsub.s32 2, %v4026_v4 }
  0x4c   :  { %3085 = vmatprep.subr.bf16.mxu1 %v4066_v47  ;;  %v131_v48 = vld [vmem:[#allocation2 + $0x1f8] sm:$0xff]  ;;  %v4121_v49 = vpack.c.bf16 %v129_v39, %v125_v37  ;;  %v124_v51 = vld [vmem:[#allocation2 + $0x1c0] sm:$0xff]  ;;  %v4124_v54 = vpack.c.bf16 %v122_v43, %v118_v42  ;;  %v126_v57 = vld [vmem:[#allocation2 + $0x1d0] sm:$0xff] }
  0x4d   :  { %3055 = vmatpush1.bf16.msra.mxu0 %v4070_v50  ;;  %v128_v52 = vld [vmem:[#allocation2 + $0x1e0] sm:$0xff]  ;;  %v4127_v55 = vpack.c.bf16 %v131_v48, %v127_v46  ;;  %v130_v58 = vld [vmem:[#allocation2 + $0x1f0] sm:$0xff]  ;;  %v138_v8 = vld [vmem:[%s4649_s3] sm:$0xf] }
  0x4e   :  { %3057 = vmatprep.subr.bf16.mxu0 %v4073_v53  ;;  %v4130_v60 = vpack.c.bf16 %v128_v52, %v124_v51  ;;  %v4134_v61 = vpack.c.bf16 %v130_v58, %v126_v57  ;;  %v143_v11 = vrot.slane %v138_v8, %v142_v7  ;;  %v147_v13 = vrot.slane %v138_v8, %v146_v10 }
  0x4f   :  { %3087 = vmatpush1.bf16.msra.mxu1 %v4076_v56  ;;  %v155_v24 = vrot.slane %v138_v8, %v154_v14  ;;  %v151_v43 = vrot.slane %v138_v8, %v150_v33 }
  0x50   :  { %3089 = vmatprep.subr.bf16.mxu1 %v4079_v59 }
  0x51   :  { %3059 = vmatpush1.bf16.msra.mxu0 %v4082_v62 }
  0x52   :  { %3061 = vmatprep.subr.bf16.mxu0 %v4085_v1 }
  0x53   :  { %3091 = vmatpush1.bf16.msra.mxu1 %v4088_v6 }
  0x54   :  { %3093 = vmatprep.subr.bf16.mxu1 %v4091_v9 }
  0x55   :  { %3063 = vmatpush1.bf16.msra.mxu0 %v4094_v12 }
  0x56   :  { %3065 = vmatprep.subr.bf16.mxu0 %v4097_v15 }
  0x57   :  { %3095 = vmatpush1.bf16.msra.mxu1 %v4100_v18 }
  0x58   :  { %3097 = vmatprep.subr.bf16.mxu1 %v4103_v22 }
  0x59   :  { %3067 = vmatpush1.bf16.msra.mxu0 %v4106_v27 }
  0x5a   :  { %3069 = vmatprep.subr.bf16.mxu0 %v4109_v31 }
  0x5b   :  { %3099 = vmatpush1.bf16.msra.mxu1 %v4112_v36 }
  0x5c   :  { %3101 = vmatprep.subr.bf16.mxu1 %v4115_v40 }
  0x5d   :  { %3071 = vmatpush1.bf16.msra.mxu0 %v4118_v45 }
  0x5e   :  { %3073 = vmatprep.subr.bf16.mxu0 %v4121_v49 }
  0x5f   :  { %3103 = vmatpush1.bf16.msra.mxu1 %v4124_v54 }
  0x60   :  { %3105 = vmatprep.subr.bf16.mxu1 %v4127_v55 }
  0x61   :  { %3075 = vmatpush1.bf16.msra.mxu0 %v4130_v60 }
  0x62   :  { %3109 = vmatprep.subr.bf16.mxu0 %v4035_v21 }
  0x63   :  { %3107 = vmatpush1.bf16.msra.mxu1 %v4134_v61 }
  0x64   :  { %398 = vmatmul.mubr.f32.vlgmr.msra.gmra.mrb[2].mxu0 %v3936_v3  ;;  %3141 = vmatprep.subr.bf16.mxu1 %v4040_v26 }
  0x65   :  { %3111 = vmatpush1.bf16.msra.mxu0 %v4038_v25  ;;  %567 = vmatprep.mubr.f32.mxu0 %v3936_v3 }
  0x66   :  { %469 = vmatmul.mubr.f32.vlgmr.msra.gmra.mrb[2].mxu1 %v3936_v3  ;;  %3113 = vmatprep.subr.bf16.mxu0 %v4043_v29 }
  0x67   :  { %3143 = vmatpush1.bf16.msra.mxu1 %v4047_v32  ;;  %638 = vmatprep.mubr.f32.mxu1 %v3936_v3 }
  0x68   :  { %3145 = vmatprep.subr.bf16.mxu1 %v4051_v35 }
  0x69   :  { %3115 = vmatpush1.bf16.msra.mxu0 %v4055_v38 }
  0x6a   :  { %3117 = vmatprep.subr.bf16.mxu0 %v4059_v41 }
  0x6b   :  { %3147 = vmatpush1.bf16.msra.mxu1 %v4062_v44 }
  0x6c   :  { %3149 = vmatprep.subr.bf16.mxu1 %v4066_v47 }
  0x6d   :  { %3119 = vmatpush1.bf16.msra.mxu0 %v4070_v50 }
  0x6e   :  { %3121 = vmatprep.subr.bf16.mxu0 %v4073_v53 }
  0x6f   :  { %3151 = vmatpush1.bf16.msra.mxu1 %v4076_v56 }
  0x70   :  { %3153 = vmatprep.subr.bf16.mxu1 %v4079_v59 }
  0x71   :  { %3123 = vmatpush1.bf16.msra.mxu0 %v4082_v62 }
  0x72   :  { %3125 = vmatprep.subr.bf16.mxu0 %v4085_v1 }
  0x73   :  { %3155 = vmatpush1.bf16.msra.mxu1 %v4088_v6 }
  0x74   :  { %3157 = vmatprep.subr.bf16.mxu1 %v4091_v9 }
  0x75   :  { %3127 = vmatpush1.bf16.msra.mxu0 %v4094_v12 }
  0x76   :  { %3129 = vmatprep.subr.bf16.mxu0 %v4097_v15 }
  0x77   :  { %3159 = vmatpush1.bf16.msra.mxu1 %v4100_v18 }
  0x78   :  { %3161 = vmatprep.subr.bf16.mxu1 %v4103_v22 }
  0x79   :  { %3131 = vmatpush1.bf16.msra.mxu0 %v4106_v27 }
  0x7a   :  { %3133 = vmatprep.subr.bf16.mxu0 %v4109_v31 }
  0x7b   :  { %3163 = vmatpush1.bf16.msra.mxu1 %v4112_v36 }
  0x7c   :  { %3165 = vmatprep.subr.bf16.mxu1 %v4115_v40 }
  0x7d   :  { %3135 = vmatpush1.bf16.msra.mxu0 %v4118_v45 }
  0x7e   :  { %3137 = vmatprep.subr.bf16.mxu0 %v4121_v49 }
  0x7f   :  { %3167 = vmatpush1.bf16.msra.mxu1 %v4124_v54 }
  0x80   :  { %3169 = vmatprep.subr.bf16.mxu1 %v4127_v55 }
  0x81   :  { %3139 = vmatpush1.bf16.msra.mxu0 %v4130_v60 }
  0x82   :  { %3173 = vmatprep.subr.bf16.mxu0 %v4035_v21 }
  0x83   :  { %3171 = vmatpush1.bf16.msra.mxu1 %v4134_v61 }
  0x84   :  { %3205 = vmatprep.subr.bf16.mxu1 %v4040_v26 }
 0x117   :  { %v257_v63 = vpop.f32.mrb[0].mxu0 }
 0x118   :  { %v259_v0 = vpop.f32.mrb[1].mxu0  ;;  %v4183_v16 = vadd.f32 %v257_v63, %v143_v11 }
 0x119   :  { %v328_v2 = vpop.f32.mrb[0].mxu1  ;;  %v4185_v17 = vadd.f32 %v259_v0, %v147_v13 }
 0x11a   :  { %v330_v5 = vpop.f32.mrb[1].mxu1  ;;  %v4193_v48 = vadd.f32 %v328_v2, %v151_v43 }
 0x11b   :  { %v4190_v42 = vadd.f32 %v330_v5, %v155_v24 }
 0x137   :  { %v399_v19 = vpop.f32.mrb[2].mxu0 }
 0x138   :  { %v475_v20 = vadd.f32 %v399_v19, %v4183_v16  ;;  %v401_v23 = vpop.f32.mrb[3].mxu0 }
 0x139   :  { %v476_v28 = vadd.f32 %v401_v23, %v4185_v17  ;;  %v470_v30 = vpop.f32.mrb[2].mxu1 }
 0x13a   :  { %v2824_v34 = vmul.f32 -1.442695, %v475_v20  ;;  %v472_v37 = vpop.f32.mrb[3].mxu1  ;;  %v477_v52 = vadd.f32 %v470_v30, %v4193_v48 }
 0x13b   :  { %v2825_v39 = vmul.f32 -1.442695, %v476_v28  ;;  %v478_v46 = vadd.f32 %v472_v37, %v4190_v42 }
 0x13c   :  { %3642 = vpow2.f32 %v2824_v34 }
 0x13d   :  { %3644 = vpow2.f32 %v2825_v39  ;;  %v2826_v51 = vmul.f32 -1.442695, %v478_v46 }
 0x13f   :  { %3646 = vpow2.f32 %v2826_v51 }
 0x140   :  { %3648 = vtanh.f32 %v477_v52 }
 0x146   :  { %v3643_v57 = vpop.eup %3642 }
 0x147   :  { %v3645_v58 = vpop.eup %3644  ;;  %v482_v63 = vadd.f32 1.0, %v3643_v57 }
 0x148   :  { %v488_v4 = vadd.f32 1.0, %v3645_v58 }
 0x149   :  { %3650 = vrcp.f32 %v482_v63  ;;  %v3647_v0 = vpop.eup %3646 }
 0x14a   :  { %3652 = vrcp.f32 %v488_v4  ;;  %v3649_v5 = vpop.eup %3648  ;;  %v495_v11 = vadd.f32 1.0, %v3647_v0 }
 0x14c   :  { %3654 = vrcp.f32 %v495_v11 }
 0x153   :  { %v3651_v7 = vpop.eup %3650 }
 0x154   :  { %v3653_v10 = vpop.eup %3652  ;;  %v499_v8 = vmul.f32 %v3651_v7, %v3649_v5 }
 0x155   :  { %v498_v13 = vmul.f32 0.0, %v3653_v10 }
 0x156   :  { %v3655_v14 = vpop.eup %3654 }
 0x157   :  { %v4196_v2 = vadd.f32 %v499_v8, %v498_v13 }
 0x159   :  { %3656 = vtanh.f32 %v4196_v2  ;;  %v681_v13 = vrot.slane %v4196_v2, 7 }
 0x163   :  { %v3657_v19 = vpop.eup %3656 }
 0x164   :  { %v4199_v20 = vmul.f32 %v3657_v19, %v3655_v14 }
 0x166   :  { %568 = vmatmul.mubr.f32.vlgmr.msra.gmra.mrb[4].mxu0 %v4199_v20  ;;  %639 = vmatmul.mubr.f32.vlgmr.msra.gmra.mrb[4].mxu1 %v4199_v20 }
 0x167   :  { %3175 = vmatpush1.bf16.msra.mxu0 %v4038_v25  ;;  %3207 = vmatpush1.bf16.msra.mxu1 %v4047_v32 }
 0x168   :  { %3177 = vmatprep.subr.bf16.mxu0 %v4043_v29  ;;  %3209 = vmatprep.subr.bf16.mxu1 %v4051_v35 }
 0x169   :  { %755 = vmatprep.mubr.f32.mxu0 %v3936_v3  ;;  %826 = vmatprep.mubr.f32.mxu1 %v3936_v3 }
 0x16b   :  { %3179 = vmatpush1.bf16.msra.mxu0 %v4055_v38  ;;  %3211 = vmatpush1.bf16.msra.mxu1 %v4062_v44 }
 0x16c   :  { %3181 = vmatprep.subr.bf16.mxu0 %v4059_v41  ;;  %3213 = vmatprep.subr.bf16.mxu1 %v4066_v47 }
 0x16f   :  { %3183 = vmatpush1.bf16.msra.mxu0 %v4070_v50  ;;  %3215 = vmatpush1.bf16.msra.mxu1 %v4076_v56 }
 0x170   :  { %3185 = vmatprep.subr.bf16.mxu0 %v4073_v53  ;;  %3217 = vmatprep.subr.bf16.mxu1 %v4079_v59 }
 0x173   :  { %3187 = vmatpush1.bf16.msra.mxu0 %v4082_v62  ;;  %3219 = vmatpush1.bf16.msra.mxu1 %v4088_v6 }
 0x174   :  { %3189 = vmatprep.subr.bf16.mxu0 %v4085_v1  ;;  %3221 = vmatprep.subr.bf16.mxu1 %v4091_v9 }
 0x177   :  { %3191 = vmatpush1.bf16.msra.mxu0 %v4094_v12  ;;  %3223 = vmatpush1.bf16.msra.mxu1 %v4100_v18 }
 0x178   :  { %3193 = vmatprep.subr.bf16.mxu0 %v4097_v15  ;;  %3225 = vmatprep.subr.bf16.mxu1 %v4103_v22 }
 0x17b   :  { %3195 = vmatpush1.bf16.msra.mxu0 %v4106_v27  ;;  %3227 = vmatpush1.bf16.msra.mxu1 %v4112_v36 }
 0x17c   :  { %3197 = vmatprep.subr.bf16.mxu0 %v4109_v31  ;;  %3229 = vmatprep.subr.bf16.mxu1 %v4115_v40 }
 0x17f   :  { %3199 = vmatpush1.bf16.msra.mxu0 %v4118_v45  ;;  %3231 = vmatpush1.bf16.msra.mxu1 %v4124_v54 }
 0x180   :  { %3201 = vmatprep.subr.bf16.mxu0 %v4121_v49  ;;  %3233 = vmatprep.subr.bf16.mxu1 %v4127_v55 }
 0x183   :  { %3203 = vmatpush1.bf16.msra.mxu0 %v4130_v60  ;;  %3235 = vmatpush1.bf16.msra.mxu1 %v4134_v61 }
 0x184   :  { %3237 = vmatprep.subr.bf16.mxu0 %v4035_v21  ;;  %3269 = vmatprep.subr.bf16.mxu1 %v4040_v26 }
 0x239   :  { %v569_v23 = vpop.f32.mrb[4].mxu0  ;;  %v640_v24 = vpop.f32.mrb[4].mxu1 }
 0x23a   :  { %v649_v28 = vrot.slane %v569_v23, 7  ;;  %v571_v30 = vpop.f32.mrb[5].mxu0  ;;  %v642_v33 = vpop.f32.mrb[5].mxu1  ;;  %v651_v57 = vrot.slane %v640_v24, 7 }
 0x23b   :  { %v650_v34 = vrot.slane %v571_v30, 7  ;;  %v652_v51 = vrot.slane %v642_v33, 7 }
 0x23c   :  { %v657_v37 = vadd.f32 %v649_v28, %v4183_v16  ;;  %v659_v63 = vadd.f32 %v651_v57, %v4193_v48 }
 0x23d   :  { %v658_v39 = vadd.f32 %v650_v34, %v4185_v17  ;;  %v660_v52 = vadd.f32 %v652_v51, %v4190_v42 }
 0x23e   :  { %v2827_v43 = vmul.f32 -1.442695, %v657_v37 }
 0x23f   :  { %v2828_v46 = vmul.f32 -1.442695, %v658_v39  ;;  %v2829_v58 = vmul.f32 -1.442695, %v660_v52 }
 0x240   :  { %3658 = vpow2.f32 %v2827_v43 }
 0x241   :  { %3660 = vpow2.f32 %v2828_v46 }
 0x242   :  { %3662 = vpow2.f32 %v2829_v58 }
 0x243   :  { %3664 = vtanh.f32 %v659_v63 }
 0x24a   :  { %v3659_v4 = vpop.eup %3658 }
 0x24b   :  { %v3661_v0 = vpop.eup %3660  ;;  %v664_v5 = vadd.f32 1.0, %v3659_v4 }
 0x24c   :  { %v670_v7 = vadd.f32 1.0, %v3661_v0  ;;  %v3663_v10 = vpop.eup %3662 }
 0x24d   :  { %3666 = vrcp.f32 %v664_v5  ;;  %v3665_v8 = vpop.eup %3664  ;;  %v677_v23 = vadd.f32 1.0, %v3663_v10 }
 0x24e   :  { %3668 = vrcp.f32 %v670_v7 }
 0x24f   :  { %3670 = vrcp.f32 %v677_v23 }
 0x257   :  { %v3667_v11 = vpop.eup %3666 }
 0x258   :  { %v3669_v14 = vpop.eup %3668  ;;  %v684_v19 = vmul.f32 %v3667_v11, %v3665_v8 }
 0x259   :  { %v683_v24 = vmul.f32 %v3669_v14, %v681_v13  ;;  %v3671_v30 = vpop.eup %3670 }
 0x25b   :  { %v4242_v28 = vadd.f32 %v684_v19, %v683_v24 }
 0x25d   :  { %3672 = vtanh.f32 %v4242_v28 }
 0x267   :  { %v3673_v33 = vpop.eup %3672 }
 0x268   :  { %v4245_v34 = vmul.f32 %v3673_v33, %v3671_v30  ;;  %v869_v33 = vrot.slane %v4242_v28, 7 }
 0x26a   :  { %v689_v37 = vrot.slane %v4245_v34, 1 }
 0x26c   :  { %756 = vmatmul.mubr.f32.vlgmr.msra.gmra.mrb[6].mxu0 %v689_v37  ;;  %827 = vmatmul.mubr.f32.vlgmr.msra.gmra.mrb[6].mxu1 %v689_v37 }
 0x26d   :  { %3239 = vmatpush1.bf16.msra.mxu0 %v4038_v25  ;;  %3271 = vmatpush1.bf16.msra.mxu1 %v4047_v32 }
 0x26e   :  { %3241 = vmatprep.subr.bf16.mxu0 %v4043_v29  ;;  %3273 = vmatprep.subr.bf16.mxu1 %v4051_v35 }
 0x26f   :  { %943 = vmatprep.mubr.f32.mxu0 %v3936_v3  ;;  %1014 = vmatprep.mubr.f32.mxu1 %v3936_v3 }
 0x271   :  { %3243 = vmatpush1.bf16.msra.mxu0 %v4055_v38  ;;  %3275 = vmatpush1.bf16.msra.mxu1 %v4062_v44 }
 0x272   :  { %3245 = vmatprep.subr.bf16.mxu0 %v4059_v41  ;;  %3277 = vmatprep.subr.bf16.mxu1 %v4066_v47 }
 0x275   :  { %3247 = vmatpush1.bf16.msra.mxu0 %v4070_v50  ;;  %3279 = vmatpush1.bf16.msra.mxu1 %v4076_v56 }
 0x276   :  { %3249 = vmatprep.subr.bf16.mxu0 %v4073_v53  ;;  %3281 = vmatprep.subr.bf16.mxu1 %v4079_v59 }
 0x279   :  { %3251 = vmatpush1.bf16.msra.mxu0 %v4082_v62  ;;  %3283 = vmatpush1.bf16.msra.mxu1 %v4088_v6 }
 0x27a   :  { %3253 = vmatprep.subr.bf16.mxu0 %v4085_v1  ;;  %3285 = vmatprep.subr.bf16.mxu1 %v4091_v9 }
 0x27d   :  { %3255 = vmatpush1.bf16.msra.mxu0 %v4094_v12  ;;  %3287 = vmatpush1.bf16.msra.mxu1 %v4100_v18 }
 0x27e   :  { %3257 = vmatprep.subr.bf16.mxu0 %v4097_v15  ;;  %3289 = vmatprep.subr.bf16.mxu1 %v4103_v22 }
 0x281   :  { %3259 = vmatpush1.bf16.msra.mxu0 %v4106_v27  ;;  %3291 = vmatpush1.bf16.msra.mxu1 %v4112_v36 }
 0x282   :  { %3261 = vmatprep.subr.bf16.mxu0 %v4109_v31  ;;  %3293 = vmatprep.subr.bf16.mxu1 %v4115_v40 }
 0x285   :  { %3263 = vmatpush1.bf16.msra.mxu0 %v4118_v45  ;;  %3295 = vmatpush1.bf16.msra.mxu1 %v4124_v54 }
 0x286   :  { %3265 = vmatprep.subr.bf16.mxu0 %v4121_v49  ;;  %3297 = vmatprep.subr.bf16.mxu1 %v4127_v55 }
 0x289   :  { %3267 = vmatpush1.bf16.msra.mxu0 %v4130_v60  ;;  %3299 = vmatpush1.bf16.msra.mxu1 %v4134_v61 }
 0x28a   :  { %3301 = vmatprep.subr.bf16.mxu0 %v4035_v21  ;;  %3333 = vmatprep.subr.bf16.mxu1 %v4040_v26 }
 0x33f   :  { %v757_v2 = vpop.f32.mrb[6].mxu0  ;;  %v828_v39 = vpop.f32.mrb[6].mxu1 }
 0x340   :  { %v837_v43 = vrot.slane %v757_v2, 6  ;;  %v759_v46 = vpop.f32.mrb[7].mxu0  ;;  %v830_v51 = vpop.f32.mrb[7].mxu1  ;;  %v839_v7 = vrot.slane %v828_v39, 6 }
 0x341   :  { %v838_v52 = vrot.slane %v759_v46, 6  ;;  %v840_v0 = vrot.slane %v830_v51, 6 }
 0x342   :  { %v845_v57 = vadd.f32 %v837_v43, %v4183_v16  ;;  %v847_v8 = vadd.f32 %v839_v7, %v4193_v48 }
 0x343   :  { %v846_v58 = vadd.f32 %v838_v52, %v4185_v17  ;;  %v848_v5 = vadd.f32 %v840_v0, %v4190_v42 }
 0x344   :  { %v2830_v63 = vmul.f32 -1.442695, %v845_v57 }
 0x345   :  { %v2831_v4 = vmul.f32 -1.442695, %v846_v58  ;;  %v2832_v10 = vmul.f32 -1.442695, %v848_v5  ;;  %v1817_v58 = vsel %vm1816_vm2, %v4199_v20, %v4245_v34 }
 0x346   :  { %3674 = vpow2.f32 %v2830_v63 }
 0x347   :  { %3676 = vpow2.f32 %v2831_v4 }
 0x348   :  { %3678 = vpow2.f32 %v2832_v10 }
 0x349   :  { %3680 = vtanh.f32 %v847_v8 }
 0x350   :  { %v3675_v11 = vpop.eup %3674 }
 0x351   :  { %v3677_v13 = vpop.eup %3676  ;;  %v852_v14 = vadd.f32 1.0, %v3675_v11 }
 0x352   :  { %v858_v19 = vadd.f32 1.0, %v3677_v13  ;;  %v3679_v23 = vpop.eup %3678 }
 0x353   :  { %3682 = vrcp.f32 %v852_v14  ;;  %v3681_v24 = vpop.eup %3680  ;;  %v865_v43 = vadd.f32 1.0, %v3679_v23 }
 0x354   :  { %3684 = vrcp.f32 %v858_v19 }
 0x355   :  { %3686 = vrcp.f32 %v865_v43 }
 0x35d   :  { %v3683_v30 = vpop.eup %3682 }
 0x35e   :  { %v3685_v37 = vpop.eup %3684  ;;  %v872_v2 = vmul.f32 %v3683_v30, %v3681_v24 }
 0x35f   :  { %v871_v39 = vmul.f32 %v3685_v37, %v869_v33  ;;  %v3687_v51 = vpop.eup %3686 }
 0x361   :  { %v4287_v46 = vadd.f32 %v872_v2, %v871_v39 }
 0x363   :  { %3688 = vtanh.f32 %v4287_v46 }
 0x36d   :  { %v3689_v52 = vpop.eup %3688 }
 0x36e   :  { %v4290_v57 = vmul.f32 %v3689_v52, %v3687_v51 }
 0x370   :  { %v877_v28 = vrot.slane %v4290_v57, 2  ;;  %v4298_v63 = vsel %vm182_vm0, %v1817_v58, %v4290_v57 }
 0x372   :  { %944 = vmatmul.mubr.f32.vlgmr.msra.gmra.mrb[8].mxu0 %v877_v28  ;;  %1015 = vmatmul.mubr.f32.vlgmr.msra.gmra.mrb[8].mxu1 %v877_v28 }
 0x373   :  { %3303 = vmatpush1.bf16.msra.mxu0 %v4038_v25  ;;  %3335 = vmatpush1.bf16.msra.mxu1 %v4047_v32 }
 0x374   :  { %3305 = vmatprep.subr.bf16.mxu0 %v4043_v29  ;;  %3337 = vmatprep.subr.bf16.mxu1 %v4051_v35 }
 0x375   :  { %1131 = vmatprep.mubr.f32.mxu0 %v3936_v3  ;;  %1202 = vmatprep.mubr.f32.mxu1 %v3936_v3 }
 0x377   :  { %3307 = vmatpush1.bf16.msra.mxu0 %v4055_v38  ;;  %3339 = vmatpush1.bf16.msra.mxu1 %v4062_v44 }
 0x378   :  { %3309 = vmatprep.subr.bf16.mxu0 %v4059_v41  ;;  %3341 = vmatprep.subr.bf16.mxu1 %v4066_v47 }
 0x37b   :  { %3311 = vmatpush1.bf16.msra.mxu0 %v4070_v50  ;;  %3343 = vmatpush1.bf16.msra.mxu1 %v4076_v56 }
 0x37c   :  { %3313 = vmatprep.subr.bf16.mxu0 %v4073_v53  ;;  %3345 = vmatprep.subr.bf16.mxu1 %v4079_v59 }
 0x37f   :  { %3315 = vmatpush1.bf16.msra.mxu0 %v4082_v62  ;;  %3347 = vmatpush1.bf16.msra.mxu1 %v4088_v6 }
 0x380   :  { %3317 = vmatprep.subr.bf16.mxu0 %v4085_v1  ;;  %3349 = vmatprep.subr.bf16.mxu1 %v4091_v9 }
 0x383   :  { %3319 = vmatpush1.bf16.msra.mxu0 %v4094_v12  ;;  %3351 = vmatpush1.bf16.msra.mxu1 %v4100_v18 }
 0x384   :  { %3321 = vmatprep.subr.bf16.mxu0 %v4097_v15  ;;  %3353 = vmatprep.subr.bf16.mxu1 %v4103_v22 }
 0x387   :  { %3323 = vmatpush1.bf16.msra.mxu0 %v4106_v27  ;;  %3355 = vmatpush1.bf16.msra.mxu1 %v4112_v36 }
 0x388   :  { %3325 = vmatprep.subr.bf16.mxu0 %v4109_v31  ;;  %3357 = vmatprep.subr.bf16.mxu1 %v4115_v40 }
 0x38b   :  { %3327 = vmatpush1.bf16.msra.mxu0 %v4118_v45  ;;  %3359 = vmatpush1.bf16.msra.mxu1 %v4124_v54 }
 0x38c   :  { %3329 = vmatprep.subr.bf16.mxu0 %v4121_v49  ;;  %3361 = vmatprep.subr.bf16.mxu1 %v4127_v55 }
 0x38f   :  { %3331 = vmatpush1.bf16.msra.mxu0 %v4130_v60  ;;  %3363 = vmatpush1.bf16.msra.mxu1 %v4134_v61 }
 0x390   :  { %3365 = vmatprep.subr.bf16.mxu0 %v4035_v21  ;;  %3397 = vmatprep.subr.bf16.mxu1 %v4040_v26 }
 0x445   :  { %v945_v4 = vpop.f32.mrb[8].mxu0  ;;  %v1016_v0 = vpop.f32.mrb[8].mxu1 }
 0x446   :  { %v1025_v5 = vrot.slane %v945_v4, 5  ;;  %v947_v7 = vpop.f32.mrb[9].mxu0  ;;  %v1018_v10 = vpop.f32.mrb[9].mxu1  ;;  %v1027_v30 = vrot.slane %v1016_v0, 5  ;;  %v1057_v4 = vrot.slane %v4287_v46, 7 }
 0x447   :  { %v1026_v8 = vrot.slane %v947_v7, 5  ;;  %v1028_v23 = vrot.slane %v1018_v10, 5 }
 0x448   :  { %v1033_v11 = vadd.f32 %v1025_v5, %v4183_v16  ;;  %v1035_v37 = vadd.f32 %v1027_v30, %v4193_v48 }
 0x449   :  { %v1034_v13 = vadd.f32 %v1026_v8, %v4185_v17  ;;  %v1036_v24 = vadd.f32 %v1028_v23, %v4190_v42 }
 0x44a   :  { %v2833_v14 = vmul.f32 -1.442695, %v1033_v11 }
 0x44b   :  { %v2834_v19 = vmul.f32 -1.442695, %v1034_v13  ;;  %v2835_v33 = vmul.f32 -1.442695, %v1036_v24 }
 0x44c   :  { %3690 = vpow2.f32 %v2833_v14 }
 0x44d   :  { %3692 = vpow2.f32 %v2834_v19 }
 0x44e   :  { %3694 = vpow2.f32 %v2835_v33 }
 0x44f   :  { %3696 = vtanh.f32 %v1035_v37 }
 0x456   :  { %v3691_v2 = vpop.eup %3690 }
 0x457   :  { %v3693_v43 = vpop.eup %3692  ;;  %v1040_v39 = vadd.f32 1.0, %v3691_v2 }
 0x458   :  { %v1046_v51 = vadd.f32 1.0, %v3693_v43  ;;  %v3695_v52 = vpop.eup %3694 }
 0x459   :  { %3698 = vrcp.f32 %v1040_v39  ;;  %v3697_v58 = vpop.eup %3696  ;;  %v1053_v10 = vadd.f32 1.0, %v3695_v52 }
 0x45a   :  { %3700 = vrcp.f32 %v1046_v51 }
 0x45b   :  { %3702 = vrcp.f32 %v1053_v10 }
 0x463   :  { %v3699_v28 = vpop.eup %3698 }
 0x464   :  { %v3701_v5 = vpop.eup %3700  ;;  %v1060_v7 = vmul.f32 %v3699_v28, %v3697_v58 }
 0x465   :  { %v1059_v0 = vmul.f32 %v3701_v5, %v1057_v4  ;;  %v3703_v11 = vpop.eup %3702 }
 0x467   :  { %v4339_v8 = vadd.f32 %v1060_v7, %v1059_v0 }
 0x469   :  { %3704 = vtanh.f32 %v4339_v8 }
 0x473   :  { %v3705_v13 = vpop.eup %3704 }
 0x474   :  { %v4342_v14 = vmul.f32 %v3705_v13, %v3703_v11 }
 0x476   :  { %v1065_v19 = vrot.slane %v4342_v14, 3  ;;  %v4348_v46 = vsel %vm1819_vm3, %v4298_v63, %v4342_v14 }
 0x478   :  { %1132 = vmatmul.mubr.f32.vlgmr.msra.gmra.mrb[10].mxu0 %v1065_v19  ;;  %1203 = vmatmul.mubr.f32.vlgmr.msra.gmra.mrb[10].mxu1 %v1065_v19 }
 0x479   :  { %3367 = vmatpush1.bf16.msra.mxu0 %v4038_v25  ;;  %3399 = vmatpush1.bf16.msra.mxu1 %v4047_v32 }
 0x47a   :  { %3369 = vmatprep.subr.bf16.mxu0 %v4043_v29  ;;  %3401 = vmatprep.subr.bf16.mxu1 %v4051_v35 }
 0x47b   :  { %1319 = vmatprep.mubr.f32.mxu0 %v3936_v3  ;;  %1390 = vmatprep.mubr.f32.mxu1 %v3936_v3 }
 0x47d   :  { %3371 = vmatpush1.bf16.msra.mxu0 %v4055_v38  ;;  %3403 = vmatpush1.bf16.msra.mxu1 %v4062_v44 }
 0x47e   :  { %3373 = vmatprep.subr.bf16.mxu0 %v4059_v41  ;;  %3405 = vmatprep.subr.bf16.mxu1 %v4066_v47 }
 0x481   :  { %3375 = vmatpush1.bf16.msra.mxu0 %v4070_v50  ;;  %3407 = vmatpush1.bf16.msra.mxu1 %v4076_v56 }
 0x482   :  { %3377 = vmatprep.subr.bf16.mxu0 %v4073_v53  ;;  %3409 = vmatprep.subr.bf16.mxu1 %v4079_v59 }
 0x485   :  { %3379 = vmatpush1.bf16.msra.mxu0 %v4082_v62  ;;  %3411 = vmatpush1.bf16.msra.mxu1 %v4088_v6 }
 0x486   :  { %3381 = vmatprep.subr.bf16.mxu0 %v4085_v1  ;;  %3413 = vmatprep.subr.bf16.mxu1 %v4091_v9 }
 0x489   :  { %3383 = vmatpush1.bf16.msra.mxu0 %v4094_v12  ;;  %3415 = vmatpush1.bf16.msra.mxu1 %v4100_v18 }
 0x48a   :  { %3385 = vmatprep.subr.bf16.mxu0 %v4097_v15  ;;  %3417 = vmatprep.subr.bf16.mxu1 %v4103_v22 }
 0x48d   :  { %3387 = vmatpush1.bf16.msra.mxu0 %v4106_v27  ;;  %3419 = vmatpush1.bf16.msra.mxu1 %v4112_v36 }
 0x48e   :  { %3389 = vmatprep.subr.bf16.mxu0 %v4109_v31  ;;  %3421 = vmatprep.subr.bf16.mxu1 %v4115_v40 }
 0x491   :  { %3391 = vmatpush1.bf16.msra.mxu0 %v4118_v45  ;;  %3423 = vmatpush1.bf16.msra.mxu1 %v4124_v54 }
 0x492   :  { %3393 = vmatprep.subr.bf16.mxu0 %v4121_v49  ;;  %3425 = vmatprep.subr.bf16.mxu1 %v4127_v55 }
 0x495   :  { %3395 = vmatpush1.bf16.msra.mxu0 %v4130_v60  ;;  %3427 = vmatpush1.bf16.msra.mxu1 %v4134_v61 }
 0x496   :  { %3429 = vmatprep.subr.bf16.mxu0 %v4035_v21  ;;  %3461 = vmatprep.subr.bf16.mxu1 %v4040_v26 }
 0x54b   :  { %v1133_v63 = vpop.f32.mrb[10].mxu0  ;;  %v1204_v23 = vpop.f32.mrb[10].mxu1 }
 0x54c   :  { %v1213_v24 = vrot.slane %v1133_v63, 4  ;;  %v1135_v30 = vpop.f32.mrb[11].mxu0  ;;  %v1206_v33 = vpop.f32.mrb[11].mxu1  ;;  %v1215_v28 = vrot.slane %v1204_v23, 4 }
 0x54d   :  { %v1214_v37 = vrot.slane %v1135_v30, 4  ;;  %v1216_v52 = vrot.slane %v1206_v33, 4 }
 0x54e   :  { %v1221_v2 = vadd.f32 %v1213_v24, %v4183_v16  ;;  %v1223_v5 = vadd.f32 %v1215_v28, %v4193_v48  ;;  %v1245_v24 = vrot.slane %v4339_v8, 7 }
 0x54f   :  { %v1222_v43 = vadd.f32 %v1214_v37, %v4185_v17  ;;  %v1224_v58 = vadd.f32 %v1216_v52, %v4190_v42 }
 0x550   :  { %v2836_v39 = vmul.f32 -1.442695, %v1221_v2 }
 0x551   :  { %v2837_v51 = vmul.f32 -1.442695, %v1222_v43  ;;  %v2838_v4 = vmul.f32 -1.442695, %v1224_v58 }
 0x552   :  { %3706 = vpow2.f32 %v2836_v39 }
 0x553   :  { %3708 = vpow2.f32 %v2837_v51 }
 0x554   :  { %3710 = vpow2.f32 %v2838_v4 }
 0x555   :  { %3712 = vtanh.f32 %v1223_v5 }
 0x55c   :  { %v3707_v7 = vpop.eup %3706 }
 0x55d   :  { %v3709_v10 = vpop.eup %3708  ;;  %v1228_v0 = vadd.f32 1.0, %v3707_v7 }
 0x55e   :  { %v1234_v11 = vadd.f32 1.0, %v3709_v10  ;;  %v3711_v13 = vpop.eup %3710 }
 0x55f   :  { %3714 = vrcp.f32 %v1228_v0  ;;  %v3713_v19 = vpop.eup %3712  ;;  %v1241_v37 = vadd.f32 1.0, %v3711_v13 }
 0x560   :  { %3716 = vrcp.f32 %v1234_v11 }
 0x561   :  { %3718 = vrcp.f32 %v1241_v37 }
 0x569   :  { %v3715_v63 = vpop.eup %3714 }
 0x56a   :  { %v3717_v30 = vpop.eup %3716  ;;  %v1248_v33 = vmul.f32 %v3715_v63, %v3713_v19 }
 0x56b   :  { %v1247_v23 = vmul.f32 %v3717_v30, %v1245_v24  ;;  %v3719_v43 = vpop.eup %3718 }
 0x56d   :  { %v4389_v2 = vadd.f32 %v1248_v33, %v1247_v23 }
 0x56f   :  { %3720 = vtanh.f32 %v4389_v2 }
 0x579   :  { %v3721_v39 = vpop.eup %3720 }
 0x57a   :  { %v4392_v51 = vmul.f32 %v3721_v39, %v3719_v43 }
 0x57c   :  { %v1253_v52 = vrot.slane %v4392_v51, 4  ;;  %v4398_v8 = vsel %vm1821_vm4, %v4348_v46, %v4392_v51 }
 0x57e   :  { %1320 = vmatmul.mubr.f32.vlgmr.msra.gmra.mrb[12].mxu0 %v1253_v52  ;;  %1391 = vmatmul.mubr.f32.vlgmr.msra.gmra.mrb[12].mxu1 %v1253_v52 }
 0x57f   :  { %3431 = vmatpush1.bf16.msra.mxu0 %v4038_v25  ;;  %3463 = vmatpush1.bf16.msra.mxu1 %v4047_v32 }
 0x580   :  { %3433 = vmatprep.subr.bf16.mxu0 %v4043_v29  ;;  %3465 = vmatprep.subr.bf16.mxu1 %v4051_v35 }
 0x581   :  { %1507 = vmatprep.mubr.f32.mxu0 %v3936_v3  ;;  %1578 = vmatprep.mubr.f32.mxu1 %v3936_v3 }
 0x583   :  { %3435 = vmatpush1.bf16.msra.mxu0 %v4055_v38  ;;  %3467 = vmatpush1.bf16.msra.mxu1 %v4062_v44 }
 0x584   :  { %3437 = vmatprep.subr.bf16.mxu0 %v4059_v41  ;;  %3469 = vmatprep.subr.bf16.mxu1 %v4066_v47 }
 0x587   :  { %3439 = vmatpush1.bf16.msra.mxu0 %v4070_v50  ;;  %3471 = vmatpush1.bf16.msra.mxu1 %v4076_v56 }
 0x588   :  { %3441 = vmatprep.subr.bf16.mxu0 %v4073_v53  ;;  %3473 = vmatprep.subr.bf16.mxu1 %v4079_v59 }
 0x58b   :  { %3443 = vmatpush1.bf16.msra.mxu0 %v4082_v62  ;;  %3475 = vmatpush1.bf16.msra.mxu1 %v4088_v6 }
 0x58c   :  { %3445 = vmatprep.subr.bf16.mxu0 %v4085_v1  ;;  %3477 = vmatprep.subr.bf16.mxu1 %v4091_v9 }
 0x58f   :  { %3447 = vmatpush1.bf16.msra.mxu0 %v4094_v12  ;;  %3479 = vmatpush1.bf16.msra.mxu1 %v4100_v18 }
 0x590   :  { %3449 = vmatprep.subr.bf16.mxu0 %v4097_v15  ;;  %3481 = vmatprep.subr.bf16.mxu1 %v4103_v22 }
 0x593   :  { %3451 = vmatpush1.bf16.msra.mxu0 %v4106_v27  ;;  %3483 = vmatpush1.bf16.msra.mxu1 %v4112_v36 }
 0x594   :  { %3453 = vmatprep.subr.bf16.mxu0 %v4109_v31  ;;  %3485 = vmatprep.subr.bf16.mxu1 %v4115_v40 }
 0x597   :  { %3455 = vmatpush1.bf16.msra.mxu0 %v4118_v45  ;;  %3487 = vmatpush1.bf16.msra.mxu1 %v4124_v54 }
 0x598   :  { %3457 = vmatprep.subr.bf16.mxu0 %v4121_v49  ;;  %3489 = vmatprep.subr.bf16.mxu1 %v4127_v55 }
 0x59b   :  { %3459 = vmatpush1.bf16.msra.mxu0 %v4130_v60  ;;  %3491 = vmatpush1.bf16.msra.mxu1 %v4134_v61 }
 0x59c   :  { %3493 = vmatprep.subr.bf16.mxu0 %v4035_v21  ;;  %3525 = vmatprep.subr.bf16.mxu1 %v4040_v26 }
 0x651   :  { %v1321_v46 = vpop.f32.mrb[12].mxu0  ;;  %v1392_v58 = vpop.f32.mrb[12].mxu1 }
 0x652   :  { %v1401_v28 = vrot.slane %v1321_v46, 3  ;;  %v1323_v4 = vpop.f32.mrb[13].mxu0  ;;  %v1394_v5 = vpop.f32.mrb[13].mxu1  ;;  %v1403_v21 = vrot.slane %v1392_v58, 3  ;;  %v1433_v46 = vrot.slane %v4389_v2, 7 }
 0x653   :  { %v1402_v7 = vrot.slane %v1323_v4, 3  ;;  %v1404_v19 = vrot.slane %v1394_v5, 3 }
 0x654   :  { %v1409_v10 = vadd.f32 %v1401_v28, %v4183_v16  ;;  %v1411_v26 = vadd.f32 %v1403_v21, %v4193_v48  ;;  %v1856_v21 = vld [vmem:[#allocation5] sm:$0xff] }
 0x655   :  { %v1410_v0 = vadd.f32 %v1402_v7, %v4185_v17  ;;  %v1412_v63 = vadd.f32 %v1404_v19, %v4190_v42 }
 0x656   :  { %v2839_v11 = vmul.f32 -1.442695, %v1409_v10 }
 0x657   :  { %v2840_v13 = vmul.f32 -1.442695, %v1410_v0  ;;  %v2841_v24 = vmul.f32 -1.442695, %v1412_v63 }
 0x658   :  { %3722 = vpow2.f32 %v2839_v11 }
 0x659   :  { %3724 = vpow2.f32 %v2840_v13 }
 0x65a   :  { %3726 = vpow2.f32 %v2841_v24  ;;  %v1857_v24 = vld [vmem:[#allocation5 + $0x8] sm:$0xff] }
 0x65b   :  { %3728 = vtanh.f32 %v1411_v26  ;;  %v3557_v26 = vpack.c.bf16 %v1857_v24, %v1856_v21 }
 0x662   :  { %v3723_v30 = vpop.eup %3722 }
 0x663   :  { %v3725_v33 = vpop.eup %3724  ;;  %v1416_v37 = vadd.f32 1.0, %v3723_v30  ;;  %v3937_v30 = vmov 0.0|0.0  }
 0x664   :  { %v1422_v23 = vadd.f32 1.0, %v3725_v33  ;;  %v3727_v43 = vpop.eup %3726  ;;  %v1858_v33 = vld [vmem:[#allocation5 + $0x10] sm:$0xff] }
 0x665   :  { %3730 = vrcp.f32 %v1416_v37  ;;  %v3729_v39 = vpop.eup %3728  ;;  %v1429_v5 = vadd.f32 1.0, %v3727_v43  ;;  %v1859_v37 = vld [vmem:[#allocation5 + $0x18] sm:$0xff]  ;;  %v1860_v43 = vld [vmem:[#allocation5 + $0x20] sm:$0xff] }
 0x666   :  { %3732 = vrcp.f32 %v1422_v23  ;;  %v3560_v23 = vpack.c.bf16 %v1859_v37, %v1858_v33 }
 0x667   :  { %3734 = vrcp.f32 %v1429_v5  ;;  %v132_v5 = vld [vmem:[#allocation7] sm:$0xff] }
 0x66f   :  { %v3731_v52 = vpop.eup %3730 }
 0x670   :  { %v3733_v28 = vpop.eup %3732  ;;  %v1436_v4 = vmul.f32 %v3731_v52, %v3729_v39  ;;  %v1861_v39 = vld [vmem:[#allocation5 + $0x28] sm:$0xff] }
 0x671   :  { %v1435_v58 = vmul.f32 %v3733_v28, %v1433_v46  ;;  %v3735_v10 = vpop.eup %3734  ;;  %v3563_v52 = vpack.c.bf16 %v1861_v39, %v1860_v43  ;;  %v1862_v46 = vld [vmem:[#allocation5 + $0x30] sm:$0xff]  ;;  %v1863_v28 = vld [vmem:[#allocation5 + $0x38] sm:$0xff] }
 0x673   :  { %v4439_v7 = vadd.f32 %v1436_v4, %v1435_v58  ;;  %v3566_v4 = vpack.c.bf16 %v1863_v28, %v1862_v46  ;;  %v1864_v58 = vld [vmem:[#allocation5 + $0x40] sm:$0xff] }
 0x675   :  { %3736 = vtanh.f32 %v4439_v7 }
 0x67f   :  { %v3737_v0 = vpop.eup %3736 }
 0x680   :  { %v4442_v11 = vmul.f32 %v3737_v0, %v3735_v10  ;;  %v133_v10 = vld [vmem:[#allocation7 + $0x8] sm:$0xff] }
 0x681   :  { %v4507_v0 = vpack.c.bf16 %v133_v10, %v132_v5  ;;  %v1840_v10 = vrot.slane %v4290_v57, 5  ;;  %v2848_v57 = vld [vmem:[%s4652_s6] ss:$0 sm:$0xff]  ;;  %s3940_s6 = smov [#allocation8]  }
 0x682   :  { %v1441_v13 = vrot.slane %v4442_v11, 5  ;;  %v4448_v2 = vsel %vm1823_vm5, %v4398_v8, %v4442_v11  ;;  %s2808_s21 = sshll.u32 %s3940_s6, 4  ;;  %s2809_s21 = int_to_ptr.vmem [resolvable:$true] %s2808_s21 }
 0x683   :  { %s3900_s22 = scalar_lea.vmem %s2809_s21, 16  ;;  %s3904_s23 = scalar_lea.vmem %s2809_s21, 32 }
 0x684   :  { %1508 = vmatmul.mubr.f32.vlgmr.msra.gmra.mrb[14].mxu0 %v1441_v13  ;;  %1579 = vmatmul.mubr.f32.vlgmr.msra.gmra.mrb[14].mxu1 %v1441_v13  ;;  %v134_v13 = vld [vmem:[#allocation7 + $0x10] sm:$0xff]  ;;  %p3901_p10 = scmp.ne.s32.totalorder %s2809_s21, %s3900_s22  ;;  %p3905_p11 = scmp.lt.s32.totalorder %s2809_s21, %s2809_s21 }
 0x685   :  { %3495 = vmatpush1.bf16.msra.mxu0 %v4038_v25  ;;  %3527 = vmatpush1.bf16.msra.mxu1 %v4047_v32  ;;  %p3906_p12 = scmp.lt.s32.totalorder %s3904_s23, %s3900_s22 }
 0x686   :  { %3497 = vmatprep.subr.bf16.mxu0 %v4043_v29  ;;  %3529 = vmatprep.subr.bf16.mxu1 %v4051_v35 }
 0x687   :  { %1695 = vmatprep.mubr.f32.mxu0 %v3936_v3  ;;  %1766 = vmatprep.mubr.f32.mxu1 %v3936_v3  ;;  %p3907_p13 = por %p3906_p12, %p3905_p11 }
 0x689   :  { %3499 = vmatpush1.bf16.msra.mxu0 %v4055_v38  ;;  %3531 = vmatpush1.bf16.msra.mxu1 %v4062_v44  ;;  %p3908_p0 = pnand %p3907_p13, %p3901_p10 }
 0x68a   :  { %3501 = vmatprep.subr.bf16.mxu0 %v4059_v41  ;;  %3533 = vmatprep.subr.bf16.mxu1 %v4066_v47 }
 0x68d   :  { %3503 = vmatpush1.bf16.msra.mxu0 %v4070_v50  ;;  %3535 = vmatpush1.bf16.msra.mxu1 %v4076_v56 }
 0x68e   :  { %3505 = vmatprep.subr.bf16.mxu0 %v4073_v53  ;;  %3537 = vmatprep.subr.bf16.mxu1 %v4079_v59 }
 0x691   :  { %3507 = vmatpush1.bf16.msra.mxu0 %v4082_v62  ;;  %3539 = vmatpush1.bf16.msra.mxu1 %v4088_v6 }
 0x692   :  { %3509 = vmatprep.subr.bf16.mxu0 %v4085_v1  ;;  %3541 = vmatprep.subr.bf16.mxu1 %v4091_v9 }
 0x695   :  { %3511 = vmatpush1.bf16.msra.mxu0 %v4094_v12  ;;  %3543 = vmatpush1.bf16.msra.mxu1 %v4100_v18 }
 0x696   :  { %3513 = vmatprep.subr.bf16.mxu0 %v4097_v15  ;;  %3545 = vmatprep.subr.bf16.mxu1 %v4103_v22 }
 0x699   :  { %3515 = vmatpush1.bf16.msra.mxu0 %v4106_v27  ;;  %3547 = vmatpush1.bf16.msra.mxu1 %v4112_v36  ;;  %v1621_v36 = vrot.slane %v4439_v7, 7  ;;  %v1865_v7 = vld [vmem:[#allocation5 + $0x48] sm:$0xff] }
 0x69a   :  { %3517 = vmatprep.subr.bf16.mxu0 %v4109_v31  ;;  %3549 = vmatprep.subr.bf16.mxu1 %v4115_v40 }
 0x69d   :  { %3519 = vmatpush1.bf16.msra.mxu0 %v4118_v45  ;;  %3551 = vmatpush1.bf16.msra.mxu1 %v4124_v54 }
 0x69e   :  { %3521 = vmatprep.subr.bf16.mxu0 %v4121_v49  ;;  %3553 = vmatprep.subr.bf16.mxu1 %v4127_v55 }
 0x6a1   :  { %3523 = vmatpush1.bf16.msra.mxu0 %v4130_v60  ;;  %3555 = vmatpush1.bf16.msra.mxu1 %v4134_v61 }
 0x6a2   :  { %3556 = vmatprep.subr.bf16.mxu0 %v3937_v30  ;;  %3580 = vmatprep.subr.bf16.mxu1 %v3937_v30 }
 0x757   :  { %v1509_v25 = vpop.f32.mrb[14].mxu0  ;;  %v1580_v29 = vpop.f32.mrb[14].mxu1 }
 0x758   :  { %v1589_v32 = vrot.slane %v1509_v25, 2  ;;  %v1511_v35 = vpop.f32.mrb[15].mxu0  ;;  %v1582_v38 = vpop.f32.mrb[15].mxu1  ;;  %v1591_v62 = vrot.slane %v1580_v29, 2  ;;  %v3569_v25 = vpack.c.bf16 %v1865_v7, %v1864_v58  ;;  %v1838_v58 = vrot.slane %v4342_v14, 7 }
 0x759   :  { %v1590_v41 = vrot.slane %v1511_v35, 2  ;;  %v1592_v56 = vrot.slane %v1582_v38, 2  ;;  %v1867_v35 = vld [vmem:[#allocation5 + $0x58] sm:$0xff] }
 0x75a   :  { %v1597_v44 = vadd.f32 %v1589_v32, %v4183_v16  ;;  %v1599_v6 = vadd.f32 %v1591_v62, %v4193_v48  ;;  %v1866_v32 = vld [vmem:[#allocation5 + $0x50] sm:$0xff] }
 0x75b   :  { %v1598_v47 = vadd.f32 %v1590_v41, %v4185_v17  ;;  %v1600_v59 = vadd.f32 %v1592_v56, %v4190_v42  ;;  %v3572_v38 = vpack.c.bf16 %v1867_v35, %v1866_v32  ;;  %v1868_v41 = vld [vmem:[#allocation5 + $0x60] sm:$0xff] }
 0x75c   :  { %v2842_v50 = vmul.f32 -1.442695, %v1597_v44  ;;  %v1869_v44 = vld [vmem:[#allocation5 + $0x68] sm:$0xff] }
 0x75d   :  { %v2843_v53 = vmul.f32 -1.442695, %v1598_v47  ;;  %v2844_v1 = vmul.f32 -1.442695, %v1600_v59  ;;  %v3575_v47 = vpack.c.bf16 %v1869_v44, %v1868_v41 }
 0x75e   :  { %3738 = vpow2.f32 %v2842_v50  ;;  %v1870_v50 = vld [vmem:[#allocation5 + $0x70] sm:$0xff] }
 0x75f   :  { %3740 = vpow2.f32 %v2843_v53  ;;  %v1871_v53 = vld [vmem:[#allocation5 + $0x78] sm:$0xff] }
 0x760   :  { %3742 = vpow2.f32 %v2844_v1  ;;  %v3578_v56 = vpack.c.bf16 %v1871_v53, %v1870_v50 }
 0x761   :  { %3744 = vtanh.f32 %v1599_v6 }
 0x768   :  { %v3739_v9 = vpop.eup %3738 }
 0x769   :  { %v3741_v12 = vpop.eup %3740  ;;  %v1604_v15 = vadd.f32 1.0, %v3739_v9 }
 0x76a   :  { %v1610_v18 = vadd.f32 1.0, %v3741_v12  ;;  %v3743_v22 = vpop.eup %3742 }
 0x76b   :  { %3746 = vrcp.f32 %v1604_v15  ;;  %v3745_v27 = vpop.eup %3744  ;;  %v1617_v49 = vadd.f32 1.0, %v3743_v22 }
 0x76c   :  { %3748 = vrcp.f32 %v1610_v18 }
 0x76d   :  { %3750 = vrcp.f32 %v1617_v49 }
 0x775   :  { %v3747_v31 = vpop.eup %3746 }
 0x776   :  { %v3749_v40 = vpop.eup %3748  ;;  %v1624_v45 = vmul.f32 %v3747_v31, %v3745_v27 }
 0x777   :  { %v1623_v54 = vmul.f32 %v3749_v40, %v1621_v36  ;;  %v3751_v60 = vpop.eup %3750 }
 0x779   :  { %v4487_v55 = vadd.f32 %v1624_v45, %v1623_v54 }
 0x77b   :  { %3752 = vtanh.f32 %v4487_v55  ;;  %v1809_v24 = vrot.slane %v4487_v55, 7  ;;  %v1836_v55 = vrot.slane %v4392_v51, 1 }
 0x785   :  { %v3753_v61 = vpop.eup %3752 }
 0x786   :  { %v4490_v8 = vmul.f32 %v3753_v61, %v3751_v60 }
 0x788   :  { %v1629_v19 = vrot.slane %v4490_v8, 6  ;;  %v4496_v63 = vsel %vm1825_vm6, %v4448_v2, %v4490_v8  ;;  %v135_v2 = vld [vmem:[#allocation7 + $0x18] sm:$0xff] }
 0x789   :  { %v4510_v29 = vpack.c.bf16 %v135_v2, %v134_v13 }
 0x78a   :  { %1696 = vmatmul.mubr.f32.vlgmr.msra.gmra.mrb[16].mxu0 %v1629_v19  ;;  %1767 = vmatmul.mubr.f32.vlgmr.msra.gmra.mrb[16].mxu1 %v1629_v19 }
 0x78b   :  { %3558 = vmatpush3.bf16.msra.mxu0 %v3557_v26  ;;  %2953 = vmatprep.mubr.msk.f32.mxu0 %vm3938_vm7, %v3936_v3 }
 0x78c   :  { %3559 = vmatprep.subr.bf16.mxu0 %v3937_v30  ;;  %2964 = vmatprep.mubr.msk.f32.mxu1 %vm3938_vm7, %v3936_v3 }
 0x78d   :  { %3582 = vmatpush3.bf16.msra.mxu1 %v4507_v0 }
 0x78e   :  { %3583 = vmatprep.subr.bf16.mxu1 %v3937_v30 }
 0x78f   :  { %3561 = vmatpush3.bf16.msra.mxu0 %v3560_v23 }
 0x790   :  { %3562 = vmatprep.subr.bf16.mxu0 %v3937_v30 }
 0x791   :  { %3585 = vmatpush3.bf16.msra.mxu1 %v4510_v29 }
 0x792   :  { %3586 = vmatprep.subr.bf16.mxu1 %v3937_v30 }
 0x793   :  { %3564 = vmatpush3.bf16.msra.mxu0 %v3563_v52  ;;  %v1832_v52 = vrot.slane %v4490_v8, 5  ;;  %v1842_v8 = vrot.slane %v4245_v34, 3 }
 0x794   :  { %3565 = vmatprep.subr.bf16.mxu0 %v3937_v30  ;;  %2965 = vmatmul.mubr.f32.vlgmr.msra.gmra.mrb[18].mxu1 %v3936_v3 }
 0x795   :  { %3588 = vmatpush3.bf16.msra.mxu1 %v4507_v0  ;;  %2975 = vmatprep.mubr.msk.f32.mxu1 %vm3938_vm7, %v3936_v3 }
 0x796   :  { %3589 = vmatprep.subr.bf16.mxu1 %v3937_v30 }
 0x797   :  { %3567 = vmatpush3.bf16.msra.mxu0 %v3566_v4  ;;  %v1834_v4 = vrot.slane %v4442_v11, 3 }
 0x798   :  { %3568 = vmatprep.subr.bf16.mxu0 %v3937_v30 }
 0x799   :  { %3591 = vmatpush3.bf16.msra.mxu1 %v4510_v29 }
 0x79a   :  { %3592 = vmatprep.subr.bf16.mxu1 %v3937_v30 }
 0x79b   :  { %3570 = vmatpush3.bf16.msra.mxu0 %v3569_v25 }
 0x79c   :  { %3571 = vmatprep.subr.bf16.mxu0 %v3937_v30 }
 0x79f   :  { %3573 = vmatpush3.bf16.msra.mxu0 %v3572_v38 }
 0x7a0   :  { %3574 = vmatprep.subr.bf16.mxu0 %v3937_v30 }
 0x7a3   :  { %3576 = vmatpush3.bf16.msra.mxu0 %v3575_v47 }
 0x7a4   :  { %3577 = vmatprep.subr.bf16.mxu0 %v3937_v30 }
 0x7a7   :  { %3579 = vmatpush3.bf16.msra.mxu0 %v3578_v56 }
 0x7a8   :  { %3604 = vmatprep.subr.bf16.mxu0 %v3937_v30 }
 0x85d   :  { %v1697_v59 = vpop.f32.mrb[16].mxu0  ;;  %v1768_v62 = vpop.f32.mrb[16].mxu1 }
 0x85e   :  { %v1777_v1 = vrot.slane %v1697_v59, 1  ;;  %v1699_v6 = vpop.f32.mrb[17].mxu0  ;;  %v1770_v9 = vpop.f32.mrb[17].mxu1  ;;  %v1779_v40 = vrot.slane %v1768_v62, 1 }
 0x85f   :  { %v1778_v12 = vrot.slane %v1699_v6, 1  ;;  %v1780_v31 = vrot.slane %v1770_v9, 1 }
 0x860   :  { %v1785_v15 = vadd.f32 %v1777_v1, %v4183_v16  ;;  %v1787_v49 = vadd.f32 %v1779_v40, %v4193_v48 }
 0x861   :  { %v1786_v18 = vadd.f32 %v1778_v12, %v4185_v17  ;;  %v1788_v36 = vadd.f32 %v1780_v31, %v4190_v42 }
 0x862   :  { %v2845_v22 = vmul.f32 -1.442695, %v1785_v15 }
 0x863   :  { %v2846_v27 = vmul.f32 -1.442695, %v1786_v18  ;;  %v2847_v45 = vmul.f32 -1.442695, %v1788_v36 }
 0x864   :  { %3754 = vpow2.f32 %v2845_v22 }
 0x865   :  { %3756 = vpow2.f32 %v2846_v27 }
 0x866   :  { %3758 = vpow2.f32 %v2847_v45 }
 0x867   :  { %3760 = vtanh.f32 %v1787_v49 }
 0x86e   :  { %v3755_v54 = vpop.eup %3754 }
 0x86f   :  { %v3757_v60 = vpop.eup %3756  ;;  %v1792_v61 = vadd.f32 1.0, %v3755_v54 }
 0x870   :  { %v1798_v19 = vadd.f32 1.0, %v3757_v60  ;;  %v3759_v16 = vpop.eup %3758 }
 0x871   :  { %3762 = vrcp.f32 %v1792_v61  ;;  %v3761_v17 = vpop.eup %3760  ;;  %v1805_v42 = vadd.f32 1.0, %v3759_v16 }
 0x872   :  { %3764 = vrcp.f32 %v1798_v19 }
 0x873   :  { %3766 = vrcp.f32 %v1805_v42 }
 0x87b   :  { %v3763_v21 = vpop.eup %3762 }
 0x87c   :  { %v3765_v26 = vpop.eup %3764  ;;  %v1812_v33 = vmul.f32 %v3763_v21, %v3761_v17 }
 0x87d   :  { %v1811_v37 = vmul.f32 %v3765_v26, %v1809_v24  ;;  %v3767_v48 = vpop.eup %3766 }
 0x87f   :  { %v1813_v23 = vadd.f32 %v1812_v33, %v1811_v37 }
 0x881   :  { %3768 = vtanh.f32 %v1813_v23 }
 0x88b   :  { %v3769_v43 = vpop.eup %3768 }
 0x88c   :  { %v1815_v39 = vmul.f32 %v3769_v43, %v3767_v48 }
 0x88e   :  { %v1828_v46 = vsel %vm1827_vm8, %v4496_v63, %v1815_v39  ;;  %v1830_v28 = vrot.slane %v1815_v39, 7  ;;  %v1845_v63 = vrot.slane %v4199_v20, 1  ;;  %v2019_v20 = vpop.f32.mrb[18].mxu1 }
 0x88f   :  { %v2966_v34 = vpop.f32.mrb[19].mxu1 }
 0x890   :  { %v1847_v5 = vsel %vm1816_vm2, %v1830_v28, %v1832_v52 }
 0x891   :  { %v1848_v7 = vsel %vm182_vm0, %v1847_v5, %v1834_v4 }
 0x892   :  { %v1849_v13 = vsel %vm1819_vm3, %v1848_v7, %v1836_v55 }
 0x893   :  { %v1850_v2 = vsel %vm1821_vm4, %v1849_v13, %v1838_v58 }
 0x894   :  { %v1851_v11 = vsel %vm1823_vm5, %v1850_v2, %v1840_v10 }
 0x895   :  { %v1852_v51 = vsel %vm1825_vm6, %v1851_v11, %v1842_v8 }
 0x896   :  { %v1853_v25 = vsel %vm1827_vm8, %v1852_v51, %v1845_v63 }
 0x897   :  { %v1855_v14 = vsel %vm1854_vm9, %v1828_v46, %v1853_v25 }
 0x898   :  { %2954 = vmatmul.mubr.f32.vlgmr.msra.gmra.mrb[18].mxu0 %v1855_v14 }
 0x899   :  { %3606 = vmatpush3.bf16.msra.mxu0 %v4507_v0  ;;  %3008 = vmatprep.mubr.msk.f32.mxu0 %vm3938_vm7, %v3936_v3 }
 0x89a   :  { %3607 = vmatprep.subr.bf16.mxu0 %v3937_v30 }
 0x89d   :  { %3609 = vmatpush3.bf16.msra.mxu0 %v4510_v29 }
 0x89e   :  { %3616 = vmatprep.subr.bf16.mxu0 %v3937_v30 }
 0x96b   :  { %v1945_v32 = vpop.f32.mrb[18].mxu0 }
 0x96c   :  { %v4557_v35 = vadd.f32 %v2848_v57, %v1945_v32  ;;  %v2955_v38 = vpop.f32.mrb[19].mxu0 }
 0x96e   :  { %v2023_v41 = vadd.f32 %v2019_v20, %v4557_v35 }
 0x970   :  { %3770 = vtanh.f32 %v2023_v41  ;;  %v2849_v47 = vmul.f32 -1.442695, %v2023_v41 }
 0x972   :  { %3772 = vpow2.f32 %v2849_v47 }
 0x97a   :  { %v3771_v44 = vpop.eup %3770 }
 0x97b   :  { %2033 = vrot.lane.b32.xlu0 %v3771_v44, %s3939_s20 }
 0x97c   :  { %v3773_v50 = vpop.eup %3772 }
 0x97d   :  { %v2027_v53 = vadd.f32 1.0, %v3773_v50 }
 0x97f   :  { %3774 = vrcp.f32 %v2027_v53 }
 0x989   :  { %v3775_v56 = vpop.eup %3774 }
 0x98a   :  { %v2031_v1 = vmul.f32 0.0, %v3775_v56 }
 0x9ed   :  { %v2034_v59 = vpop.permute.xlu0 %2033 }
 0x9ee   :  { %v2036_v62 = vmul.f32 %v3775_v56, %v2034_v59 }
 0x9f0   :  { %2038 = vrot.lane.b32.xlu0 %v2036_v62, %s3933_s25 }
 0xa62   :  { %v2039_v6 = vpop.permute.xlu0 %2038 }
 0xa63   :  { %v2041_v9 = vadd.f32 %v2039_v6, %v2031_v1 }
 0xa65   :  { %3776 = vtanh.f32 %v2041_v9  ;;  %v2135_v17 = vrot.slane %v2041_v9, 7 }
 0xa6f   :  { %v3777_v12 = vpop.eup %3776 }
 0xa70   :  { %2044 = vrot.lane.b32.xlu1 %v3777_v12, %s3939_s20 }
 0xae2   :  { %v2045_v15 = vpop.permute.xlu1 %2044 }
 0xae3   :  { %v2047_v18 = vmul.f32 %v3775_v56, %v2045_v15 }
 0xae5   :  { %2049 = vrot.lane.b32.xlu1 %v2047_v18, %s3933_s25 }
 0xb57   :  { %v2050_v22 = vpop.permute.xlu1 %2049 }
 0xb58   :  { %2976 = vmatmul.mubr.msk.f32.vlgmr.msra.gmra.mrb[20].mxu1 %vm1949_vm10, %v2050_v22 }
 0xb59   :  { %3594 = vmatpush3.bf16.msra.mxu1 %v4507_v0  ;;  %2986 = vmatprep.mubr.msk.f32.mxu1 %vm3938_vm7, %v3936_v3 }
 0xb5a   :  { %3595 = vmatprep.subr.bf16.mxu1 %v3937_v30 }
 0xb5d   :  { %3597 = vmatpush3.bf16.msra.mxu1 %v4510_v29 }
 0xb5e   :  { %3598 = vmatprep.subr.bf16.mxu1 %v3937_v30 }
 0xc2b   :  { %v2119_v27 = vpop.f32.mrb[20].mxu1 }
 0xc2c   :  { %v2124_v31 = vrot.slane %v2119_v27, 7  ;;  %v2977_v36 = vpop.f32.mrb[21].mxu1 }
 0xc2e   :  { %v2126_v40 = vadd.f32 %v2124_v31, %v4557_v35 }
 0xc30   :  { %3778 = vtanh.f32 %v2126_v40  ;;  %v2851_v49 = vmul.f32 -1.442695, %v2126_v40 }
 0xc32   :  { %3780 = vpow2.f32 %v2851_v49 }
 0xc3a   :  { %v3779_v45 = vpop.eup %3778 }
 0xc3b   :  { %2139 = vrot.lane.b32.xlu0 %v3779_v45, %s3939_s20 }
 0xc3c   :  { %v3781_v54 = vpop.eup %3780 }
 0xc3d   :  { %v2130_v60 = vadd.f32 1.0, %v3781_v54 }
 0xc3f   :  { %3782 = vrcp.f32 %v2130_v60 }
 0xc49   :  { %v3783_v61 = vpop.eup %3782 }
 0xc4a   :  { %v2137_v21 = vmul.f32 %v3783_v61, %v2135_v17 }
 0xcad   :  { %v2140_v19 = vpop.permute.xlu0 %2139 }
 0xcae   :  { %v2142_v16 = vmul.f32 %v3783_v61, %v2140_v19 }
 0xcb0   :  { %2144 = vrot.lane.b32.xlu1 %v2142_v16, %s3933_s25 }
 0xd22   :  { %v2145_v24 = vpop.permute.xlu1 %2144 }
 0xd23   :  { %v2147_v26 = vadd.f32 %v2145_v24, %v2137_v21 }
 0xd25   :  { %3784 = vtanh.f32 %v2147_v26  ;;  %v2242_v13 = vrot.slane %v2147_v26, 7 }
 0xd2f   :  { %v3785_v33 = vpop.eup %3784 }
 0xd30   :  { %2150 = vrot.lane.b32.xlu0 %v3785_v33, %s3939_s20 }
 0xda2   :  { %v2151_v42 = vpop.permute.xlu0 %2150 }
 0xda3   :  { %v2153_v37 = vmul.f32 %v3783_v61, %v2151_v42 }
 0xda5   :  { %v2155_v23 = vrot.slane %v2153_v37, 1 }
 0xda7   :  { %2156 = vrot.lane.b32.xlu1 %v2155_v23, %s3933_s25 }
 0xe19   :  { %v2157_v48 = vpop.permute.xlu1 %2156 }
 0xe1a   :  { %2987 = vmatmul.mubr.msk.f32.vlgmr.msra.gmra.mrb[22].mxu1 %vm1949_vm10, %v2157_v48 }
 0xe1b   :  { %3600 = vmatpush3.bf16.msra.mxu1 %v4507_v0  ;;  %2997 = vmatprep.mubr.msk.f32.mxu1 %vm3938_vm7, %v3936_v3 }
 0xe1c   :  { %3601 = vmatprep.subr.bf16.mxu1 %v3937_v30 }
 0xe1f   :  { %3603 = vmatpush3.bf16.msra.mxu1 %v4510_v29 }
 0xe20   :  { %3610 = vmatprep.subr.bf16.mxu1 %v3937_v30 }
 0xeed   :  { %v2226_v43 = vpop.f32.mrb[22].mxu1 }
 0xeee   :  { %v2231_v39 = vrot.slane %v2226_v43, 6  ;;  %v2988_v52 = vpop.f32.mrb[23].mxu1 }
 0xef0   :  { %v2233_v46 = vadd.f32 %v2231_v39, %v4557_v35 }
 0xef2   :  { %3786 = vtanh.f32 %v2233_v46  ;;  %v2853_v4 = vmul.f32 -1.442695, %v2233_v46 }
 0xef4   :  { %3788 = vpow2.f32 %v2853_v4 }
 0xefc   :  { %v3787_v28 = vpop.eup %3786 }
 0xefd   :  { %2246 = vrot.lane.b32.xlu0 %v3787_v28, %s3939_s20 }
 0xefe   :  { %v3789_v55 = vpop.eup %3788 }
 0xeff   :  { %v2237_v5 = vadd.f32 1.0, %v3789_v55 }
 0xf01   :  { %3790 = vrcp.f32 %v2237_v5 }
 0xf0b   :  { %v3791_v58 = vpop.eup %3790 }
 0xf0c   :  { %v2244_v8 = vmul.f32 %v3791_v58, %v2242_v13 }
 0xf6f   :  { %v2247_v7 = vpop.permute.xlu0 %2246 }
 0xf70   :  { %v2249_v10 = vmul.f32 %v3791_v58, %v2247_v7 }
 0xf72   :  { %2251 = vrot.lane.b32.xlu1 %v2249_v10, %s3933_s25 }
 0xfe4   :  { %v2252_v2 = vpop.permute.xlu1 %2251 }
 0xfe5   :  { %v2254_v63 = vadd.f32 %v2252_v2, %v2244_v8 }
 0xfe7   :  { %3792 = vtanh.f32 %v2254_v63  ;;  %v2349_v62 = vrot.slane %v2254_v63, 7 }
 0xff1   :  { %v3793_v11 = vpop.eup %3792 }
 0xff2   :  { %2257 = vrot.lane.b32.xlu0 %v3793_v11, %s3939_s20 }
0x1064   :  { %v2258_v51 = vpop.permute.xlu0 %2257 }
0x1065   :  { %v2260_v25 = vmul.f32 %v3791_v58, %v2258_v51 }
0x1067   :  { %v2262_v14 = vrot.slane %v2260_v25, 2 }
0x1069   :  { %2263 = vrot.lane.b32.xlu1 %v2262_v14, %s3933_s25 }
0x10db   :  { %v2264_v20 = vpop.permute.xlu1 %2263 }
0x10dc   :  { %2998 = vmatmul.mubr.msk.f32.vlgmr.msra.gmra.mrb[24].mxu1 %vm1949_vm10, %v2264_v20 }
0x10dd   :  { %3612 = vmatpush3.bf16.msra.mxu1 %v4507_v0  ;;  %3019 = vmatprep.mubr.msk.f32.mxu1 %vm3938_vm7, %v3936_v3 }
0x10de   :  { %3613 = vmatprep.subr.bf16.mxu1 %v3937_v30 }
0x10e1   :  { %3615 = vmatpush3.bf16.msra.mxu1 %v4510_v29 }
0x10e2   :  { %3622 = vmatprep.subr.bf16.mxu1 %v3937_v30 }
0x11af   :  { %v2333_v34 = vpop.f32.mrb[24].mxu1 }
0x11b0   :  { %v2338_v57 = vrot.slane %v2333_v34, 5  ;;  %v2999_v32 = vpop.f32.mrb[25].mxu1 }
0x11b2   :  { %v2340_v38 = vadd.f32 %v2338_v57, %v4557_v35 }
0x11b4   :  { %3794 = vtanh.f32 %v2340_v38  ;;  %v2855_v44 = vmul.f32 -1.442695, %v2340_v38 }
0x11b6   :  { %3796 = vpow2.f32 %v2855_v44 }
0x11be   :  { %v3795_v41 = vpop.eup %3794 }
0x11bf   :  { %2353 = vrot.lane.b32.xlu0 %v3795_v41, %s3939_s20 }
0x11c0   :  { %v3797_v47 = vpop.eup %3796 }
0x11c1   :  { %v2344_v50 = vadd.f32 1.0, %v3797_v47 }
0x11c3   :  { %3798 = vrcp.f32 %v2344_v50 }
0x11cd   :  { %v3799_v53 = vpop.eup %3798 }
0x11ce   :  { %v2351_v1 = vmul.f32 %v3799_v53, %v2349_v62 }
0x1231   :  { %v2354_v56 = vpop.permute.xlu0 %2353 }
0x1232   :  { %v2356_v59 = vmul.f32 %v3799_v53, %v2354_v56 }
0x1234   :  { %2358 = vrot.lane.b32.xlu1 %v2356_v59, %s3933_s25 }
0x12a6   :  { %v2359_v6 = vpop.permute.xlu1 %2358 }
0x12a7   :  { %v2361_v9 = vadd.f32 %v2359_v6, %v2351_v1 }
0x12a9   :  { %3800 = vtanh.f32 %v2361_v9  ;;  %v2456_v21 = vrot.slane %v2361_v9, 7 }
0x12b3   :  { %v3801_v12 = vpop.eup %3800 }
0x12b4   :  { %2364 = vrot.lane.b32.xlu0 %v3801_v12, %s3939_s20 }
0x1326   :  { %v2365_v15 = vpop.permute.xlu0 %2364 }
0x1327   :  { %v2367_v18 = vmul.f32 %v3799_v53, %v2365_v15 }
0x1329   :  { %v2369_v22 = vrot.slane %v2367_v18, 3 }
0x132b   :  { %2370 = vrot.lane.b32.xlu1 %v2369_v22, %s3933_s25 }
0x139d   :  { %v2371_v27 = vpop.permute.xlu1 %2370 }
0x139e   :  { %3009 = vmatmul.mubr.msk.f32.vlgmr.msra.gmra.mrb[20].mxu0 %vm1949_vm10, %v2371_v27 }
0x139f   :  { %3618 = vmatpush3.bf16.msra.mxu0 %v4507_v0  ;;  %3030 = vmatprep.mubr.msk.f32.mxu0 %vm3938_vm7, %v3936_v3 }
0x13a0   :  { %3619 = vmatprep.subr.bf16.mxu0 %v3937_v30 }
0x13a3   :  { %3621 = vmatpush3.bf16.msra.mxu0 %v4510_v29 }
0x1471   :  { %v2440_v31 = vpop.f32.mrb[20].mxu0 }
0x1472   :  { %v2445_v36 = vrot.slane %v2440_v31, 4  ;;  %v3010_v40 = vpop.f32.mrb[21].mxu0 }
0x1474   :  { %v2447_v45 = vadd.f32 %v2445_v36, %v4557_v35 }
0x1476   :  { %3802 = vtanh.f32 %v2447_v45  ;;  %v2857_v54 = vmul.f32 -1.442695, %v2447_v45 }
0x1478   :  { %3804 = vpow2.f32 %v2857_v54 }
0x1480   :  { %v3803_v49 = vpop.eup %3802 }
0x1481   :  { %2460 = vrot.lane.b32.xlu0 %v3803_v49, %s3939_s20 }
0x1482   :  { %v3805_v60 = vpop.eup %3804 }
0x1483   :  { %v2451_v61 = vadd.f32 1.0, %v3805_v60 }
0x1485   :  { %3806 = vrcp.f32 %v2451_v61 }
0x148f   :  { %v3807_v19 = vpop.eup %3806 }
0x1490   :  { %v2458_v24 = vmul.f32 %v3807_v19, %v2456_v21 }
0x14f3   :  { %v2461_v16 = vpop.permute.xlu0 %2460 }
0x14f4   :  { %v2463_v17 = vmul.f32 %v3807_v19, %v2461_v16 }
0x14f6   :  { %2465 = vrot.lane.b32.xlu1 %v2463_v17, %s3933_s25 }
0x1568   :  { %v2466_v26 = vpop.permute.xlu1 %2465 }
0x1569   :  { %v2468_v33 = vadd.f32 %v2466_v26, %v2458_v24 }
0x156b   :  { %3808 = vtanh.f32 %v2468_v33 }
0x1575   :  { %v3809_v42 = vpop.eup %3808 }
0x1576   :  { %2471 = vrot.lane.b32.xlu0 %v3809_v42, %s3939_s20 }
0x15e8   :  { %v2472_v37 = vpop.permute.xlu0 %2471 }
0x15e9   :  { %v2474_v23 = vmul.f32 %v3807_v19, %v2472_v37 }
0x15eb   :  { %v2476_v48 = vrot.slane %v2474_v23, 4 }
0x15ed   :  { %2477 = vrot.lane.b32.xlu1 %v2476_v48, %s3933_s25 }
0x165f   :  { %v2478_v43 = vpop.permute.xlu1 %2477 }
0x1660   :  { %3020 = vmatmul.mubr.msk.f32.vlgmr.msra.gmra.mrb[26].mxu1 %vm1949_vm10, %v2478_v43 }
0x1661   :  { %3624 = vmatpush3.bf16.msra.mxu1 %v4507_v0  ;;  %3041 = vmatprep.mubr.msk.f32.mxu1 %vm3938_vm7, %v3936_v3 }
0x1662   :  { %3625 = vmatprep.subr.bf16.mxu1 %v3937_v30  ;;  %v2563_v30 = vrot.slane %v2468_v33, 7 }
0x1665   :  { %3627 = vmatpush3.bf16.msra.mxu1 %v4510_v29 }
0x1733   :  { %v2547_v39 = vpop.f32.mrb[26].mxu1 }
0x1734   :  { %v2552_v52 = vrot.slane %v2547_v39, 3  ;;  %v3021_v46 = vpop.f32.mrb[27].mxu1 }
0x1736   :  { %v2554_v28 = vadd.f32 %v2552_v52, %v4557_v35 }
0x1738   :  { %3810 = vtanh.f32 %v2554_v28  ;;  %v2859_v55 = vmul.f32 -1.442695, %v2554_v28 }
0x173a   :  { %3812 = vpow2.f32 %v2859_v55 }
0x1742   :  { %v3811_v4 = vpop.eup %3810 }
0x1743   :  { %2567 = vrot.lane.b32.xlu0 %v3811_v4, %s3939_s20 }
0x1744   :  { %v3813_v5 = vpop.eup %3812 }
0x1745   :  { %v2558_v0 = vadd.f32 1.0, %v3813_v5 }
0x1747   :  { %3814 = vrcp.f32 %v2558_v0 }
0x1751   :  { %v3815_v58 = vpop.eup %3814 }
0x1752   :  { %v2565_v29 = vmul.f32 %v3815_v58, %v2563_v30 }
0x17b5   :  { %v2568_v3 = vpop.permute.xlu0 %2567 }
0x17b6   :  { %v2570_v7 = vmul.f32 %v3815_v58, %v2568_v3 }
0x17b8   :  { %2572 = vrot.lane.b32.xlu1 %v2570_v7, %s3933_s25 }
0x182a   :  { %v2573_v10 = vpop.permute.xlu1 %2572 }
0x182b   :  { %v2575_v13 = vadd.f32 %v2573_v10, %v2565_v29 }
0x182d   :  { %3816 = vtanh.f32 %v2575_v13  ;;  %v2670_v53 = vrot.slane %v2575_v13, 7 }
0x1837   :  { %v3817_v8 = vpop.eup %3816 }
0x1838   :  { %2578 = vrot.lane.b32.xlu0 %v3817_v8, %s3939_s20 }
0x18aa   :  { %v2579_v2 = vpop.permute.xlu0 %2578 }
0x18ab   :  { %v2581_v63 = vmul.f32 %v3815_v58, %v2579_v2 }
0x18ad   :  { %v2583_v11 = vrot.slane %v2581_v63, 5 }
0x18af   :  { %2584 = vrot.lane.b32.xlu1 %v2583_v11, %s3933_s25 }
0x1921   :  { %v2585_v51 = vpop.permute.xlu1 %2584 }
0x1922   :  { %3031 = vmatmul.mubr.msk.f32.vlgmr.msra.gmra.mrb[22].mxu0 %vm1949_vm10, %v2585_v51 }
0x19f5   :  { %v2654_v25 = vpop.f32.mrb[22].mxu0 }
0x19f6   :  { %v2659_v14 = vrot.slane %v2654_v25, 2  ;;  %v3032_v20 = vpop.f32.mrb[23].mxu0 }
0x19f8   :  { %v2661_v34 = vadd.f32 %v2659_v14, %v4557_v35 }
0x19fa   :  { %3818 = vtanh.f32 %v2661_v34  ;;  %v2861_v32 = vmul.f32 -1.442695, %v2661_v34 }
0x19fc   :  { %3820 = vpow2.f32 %v2861_v32 }
0x1a04   :  { %v3819_v57 = vpop.eup %3818 }
0x1a05   :  { %2674 = vrot.lane.b32.xlu0 %v3819_v57, %s3939_s20 }
0x1a06   :  { %v3821_v38 = vpop.eup %3820 }
0x1a07   :  { %v2665_v41 = vadd.f32 1.0, %v3821_v38 }
0x1a09   :  { %3822 = vrcp.f32 %v2665_v41 }
0x1a13   :  { %v3823_v44 = vpop.eup %3822 }
0x1a14   :  { %v2672_v56 = vmul.f32 %v3823_v44, %v2670_v53 }
0x1a77   :  { %v2675_v47 = vpop.permute.xlu0 %2674 }
0x1a78   :  { %v2677_v50 = vmul.f32 %v3823_v44, %v2675_v47 }
0x1a7a   :  { %2679 = vrot.lane.b32.xlu1 %v2677_v50, %s3933_s25 }
0x1aec   :  { %v2680_v59 = vpop.permute.xlu1 %2679 }
0x1aed   :  { %v2682_v62 = vadd.f32 %v2680_v59, %v2672_v56 }
0x1aef   :  { %3824 = vtanh.f32 %v2682_v62  ;;  %v2777_v19 = vrot.slane %v2682_v62, 7 }
0x1af9   :  { %v3825_v1 = vpop.eup %3824 }
0x1afa   :  { %2685 = vrot.lane.b32.xlu0 %v3825_v1, %s3939_s20 }
0x1b6c   :  { %v2686_v6 = vpop.permute.xlu0 %2685 }
0x1b6d   :  { %v2688_v9 = vmul.f32 %v3823_v44, %v2686_v6 }
0x1b6f   :  { %v2690_v12 = vrot.slane %v2688_v9, 6 }
0x1b71   :  { %2691 = vrot.lane.b32.xlu1 %v2690_v12, %s3933_s25 }
0x1be3   :  { %v2692_v15 = vpop.permute.xlu1 %2691 }
0x1be4   :  { %3042 = vmatmul.mubr.msk.f32.vlgmr.msra.gmra.mrb[28].mxu1 %vm1949_vm10, %v2692_v15 }
0x1cb7   :  { %v2761_v18 = vpop.f32.mrb[28].mxu1 }
0x1cb8   :  { %v2766_v22 = vrot.slane %v2761_v18, 1  ;;  %v3043_v27 = vpop.f32.mrb[29].mxu1 }
0x1cba   :  { %v2768_v31 = vadd.f32 %v2766_v22, %v4557_v35 }
0x1cbc   :  { %3826 = vtanh.f32 %v2768_v31  ;;  %v2863_v40 = vmul.f32 -1.442695, %v2768_v31 }
0x1cbe   :  { %3828 = vpow2.f32 %v2863_v40 }
0x1cc6   :  { %v3827_v36 = vpop.eup %3826 }
0x1cc7   :  { %2781 = vrot.lane.b32.xlu0 %v3827_v36, %s3939_s20 }
0x1cc8   :  { %v3829_v45 = vpop.eup %3828 }
0x1cc9   :  { %v2772_v49 = vadd.f32 1.0, %v3829_v45 }
0x1ccb   :  { %3830 = vrcp.f32 %v2772_v49 }
0x1cd5   :  { %v3831_v54 = vpop.eup %3830 }
0x1cd6   :  { %v2779_v16 = vmul.f32 %v3831_v54, %v2777_v19 }
0x1d39   :  { %v2782_v60 = vpop.permute.xlu0 %2781 }
0x1d3a   :  { %v2784_v61 = vmul.f32 %v3831_v54, %v2782_v60 }
0x1d3c   :  { %2786 = vrot.lane.b32.xlu1 %v2784_v61, %s3933_s25 }
0x1dae   :  { %v2787_v17 = vpop.permute.xlu1 %2786 }
0x1daf   :  { %v2789_v21 = vadd.f32 %v2787_v17, %v2779_v16 }
0x1db1   :  { %3832 = vtanh.f32 %v2789_v21 }
0x1dbb   :  { %v3833_v35 = vpop.eup %3832 }
0x1dbc   :  { %2792 = vrot.lane.b32.xlu0 %v3833_v35, %s3939_s20 }
0x1e2e   :  { %v2793_v24 = vpop.permute.xlu0 %2792 }
0x1e2f   :  { %v2795_v26 = vmul.f32 %v3831_v54, %v2793_v24 }
0x1e31   :  { %2797 = vrot.lane.b32.xlu1 %v2795_v26, %s3933_s25 }
0x1ea3   :  { %v2798_v33 = vpop.permute.xlu1 %2797 }
0x1ea4   :  { %2801 = vst.msk [vmem:[#allocation8 - $0x7] sm:$0x80] %vm2800_vm11, %v2798_v33 }
0x1ea5   :  { %3911 = shalt.err (!%p3908_p0)
}
0x1ea6   :  { %s3912_s26 = scalar_lea.hbm %s4653_s7, 16 }
0x1ea7   :  { %p3913_p1 = scmp.ne.s32.totalorder %s4653_s7, %s3912_s26  ;;  %p3916_p2 = scmp.lt.u32.totalorder %s3912_s26, %s4653_s7 }
0x1ea9   :  { %p3918_p3 = pnand %p3916_p2, %p3913_p1 }
0x1eab   :  { %3921 = shalt.err (!%p3918_p3)
}
0x1eac   :  { %2811 = dma.vmem_to_hbm [thread:$0]  %s2809_s21, 16, %s4653_s7, [#allocation4]  }
0x1ead   :  { %3926 = dma.done.wait [#allocation4], 16  }
0x1eae   :  { %3927 = vsyncadd [#allocation4], 4294967280 }
0x1eaf   :  { %2815 = vsyncpa [#allocation3], 1 }
0x1eb0   :  { %2816 = vsyncpa [#allocation6], 1 }
0x1eb1   :  { %2817 = vsyncpa [#allocation4], 1 }

</bundles_post_ra>
